<compile_context>
chip_gen: v5e
topology: v5e:2x2
jax: 0.10.0
libtpu: 0.0.40
codegen_flags: <defaults>
</compile_context>

<pallas_src>
import math

import jax
import jax.numpy as jnp
from jax import lax
from jax.experimental import pallas as pl
from jax.experimental.pallas import tpu as pltpu

NUM_TOKENS = 14
NUM_ROUNDS = 5
NUM_CLASSES = 10
OUT_PAD = 128  # lane-dense classifier output; sliced to NUM_CLASSES outside.


def _make_gnn_kernel(block_b, S, D):
    n = block_b * S       # node rows per grid step
    rows = n * S          # pair rows per grid step

    def kernel(x0_ref, wa_ref, w1a_ref, w1b_ref, b1_ref, w2_ref, b2_ref,
               ow1_ref, ob1_ref, ow2_ref, out_ref):
        x = x0_ref[...]            # (n, D)
        wa = wa_ref[...]           # (n, rows) block-diag scatter of A^T
        w1a = w1a_ref[...]         # (D, D)  msg_fc1 weight, x_i half (pre-T)
        w1b = w1b_ref[...]         # (D, D)  msg_fc1 weight, x_j half (pre-T)
        w2 = w2_ref[...]           # (D, D)  msg_fc2 weight (pre-T)
        ow1 = ow1_ref[...]         # (D, D)  out_fc1 weight (pre-T)
        ow2 = ow2_ref[...]         # (D, OUT_PAD), zero-padded past NUM_CLASSES

        # Hoisted broadcasts — JAX does not CSE broadcast_in_dim, so keep them
        # out of the unrolled 5-round loop.
        b1f = jnp.broadcast_to(b1_ref[...], (n, D))
        b2f = jnp.broadcast_to(b2_ref[...], (rows, D))
        ob1f = jnp.broadcast_to(ob1_ref[...], (n, D))

        def round_body(_, x):
            # msg_fc1(cat(x_i, x_j)) = x_i @ W1a^T + x_j @ W1b^T + b1.
            # NOTE: kept as two MXU pushes sharing the loaded x instead of one
            # fused (D, 2D) matmul — the fused form needs an offset-D lane
            # slice of the result whose Mosaic lowering is not guaranteed.
            p = jnp.dot(x, w1a, preferred_element_type=jnp.float32) + b1f  # (n, D)
            q = jnp.dot(x, w1b, preferred_element_type=jnp.float32)        # (n, D)
            # q_g[b*S + i, j, :] = q[b*S + j, :]  (tile each batch's S rows)
            q_g = jnp.broadcast_to(
                q.reshape(block_b, 1, S, D),
                (block_b, S, S, D)).reshape(n, S, D)
            h = jnp.maximum(p[:, None, :] + q_g, 0.0).reshape(rows, D)
            # TODO(synk): dropout(p=0.1) is identity here (inference mode);
            # training-mode dropout is not implemented.
            m = jnp.maximum(
                jnp.dot(h, w2, preferred_element_type=jnp.float32) + b2f, 0.0)
            # msg[b, i] = sum_j A[b, j, i] * m[b, i, j]
            # Done as one MXU matmul with the block-diagonal A^T matrix `wa`
            # (built once in the wrapper) instead of a VPU multiply plus an
            # XLU cross-sublane reduction.
            msg = jnp.dot(wa, m, preferred_element_type=jnp.float32)       # (n, D)
            return x + msg

        x = lax.fori_loop(0, NUM_ROUNDS, round_body, x, unroll=True)

        # Output head on every node (row 0 of each batch is the "out" head).
        ho = jnp.maximum(
            jnp.dot(x, ow1, preferred_element_type=jnp.float32) + ob1f, 0.0)
        out_ref[...] = jnp.dot(ho, ow2, preferred_element_type=jnp.float32)

    return kernel


def gnn_arb_forward(tok, A, params, *, block_b=None):
    """Returns (out[B,10], x_full[B,S,10]) matching the PyTorch module."""
    B, S = tok.shape
    D = params["embed"].shape[1]

    if block_b is None:
        # Fill the MXU M dimension (target >=128 pair rows per step for the
        # msg_fc2 matmul) while still yielding >=2 parallel grid steps on
        # larger batches so v7x's two TensorCores both get work.
        target = max(1, min(B, pl.cdiv(128, S * S)))
        block_b = max(d for d in range(1, target + 1) if B % d == 0)
    assert B % block_b == 0, "block_b must divide the batch"
    num_blocks = B // block_b
    n = block_b * S
    rows = n * S

    # Embedding lookup (gather) stays in JAX glue; fold batch into rows.
    x0 = jnp.take(params["embed"], tok, axis=0).astype(jnp.float32)
    x0 = x0.reshape(B * S, D)

    # Pre-transpose A once in XLA: A_t[b*S + i, j] = A[b, j, i], then scatter
    # it into a per-grid-block block-diagonal matrix W_A so the in-kernel
    # neighbour sum is a single MXU matmul:
    #   W_A[r, (r mod n)*S + j] = A_t[r, j]
    A_t = jnp.swapaxes(A.astype(jnp.float32), 1, 2).reshape(B * S, S)
    r_loc = jnp.arange(B * S) % n                                    # (B*S,)
    blk_sel = (r_loc[:, None] == jnp.arange(n)[None, :]).astype(jnp.float32)
    W_A = (blk_sel[:, :, None] * A_t[:, None, :]).reshape(B * S, rows)

    w1 = params["msg_fc1_w"]              # (D, 2D)
    w1a = w1[:, :D].T                     # (D, D) — x_i half
    w1b = w1[:, D:].T                     # (D, D) — x_j half
    b1 = params["msg_fc1_b"].reshape(1, D)
    w2t = params["msg_fc2_w"].T
    b2 = params["msg_fc2_b"].reshape(1, D)
    ow1t = params["out_fc1_w"].T
    ob1 = params["out_fc1_b"].reshape(1, D)
    # Zero-pad the classifier weight to a lane-dense 128-wide output.
    ow2_pad = jnp.zeros((D, OUT_PAD), jnp.float32)
    ow2_pad = ow2_pad.at[:, :NUM_CLASSES].set(params["out_fc2_w"].T)

    kernel = _make_gnn_kernel(block_b, S, D)

    def wspec(r, c):
        return pl.BlockSpec((r, c), lambda b: (0, 0))

    y = pl.pallas_call(
        kernel,
        out_shape=jax.ShapeDtypeStruct((B * S, OUT_PAD), jnp.float32),
        grid_spec=pltpu.PrefetchScalarGridSpec(
            num_scalar_prefetch=0,
            grid=(num_blocks,),
            in_specs=[
                pl.BlockSpec((n, D), lambda b: (b, 0)),     # x0 rows (batch block)
                pl.BlockSpec((n, rows), lambda b: (b, 0)),  # block-diag A^T rows
                wspec(D, D),                                # msg_fc1 w (x_i half)
                wspec(D, D),                                # msg_fc1 w (x_j half)
                wspec(1, D),                                # msg_fc1 b
                wspec(D, D),                                # msg_fc2 w
                wspec(1, D),                                # msg_fc2 b
                wspec(D, D),                                # out_fc1 w
                wspec(1, D),                                # out_fc1 b
                wspec(D, OUT_PAD),                          # out_fc2 w (lane-padded)
            ],
            out_specs=pl.BlockSpec((n, OUT_PAD), lambda b: (b, 0)),
        ),
        compiler_params=pltpu.CompilerParams(
            dimension_semantics=("parallel",)),
    )(x0, W_A, w1a, w1b, b1, w2t, b2, ow1t, ob1, ow2_pad)

    x_full = y[:, :NUM_CLASSES].reshape(B, S, NUM_CLASSES)
    out = x_full[:, 0, :]
    return out, x_full


def ref_forward(tok, A, params):
    """Pure-JAX reference mirroring the PyTorch forward exactly."""
    x = params["embed"][tok]
    B, S, D = x.shape
    w1, b1 = params["msg_fc1_w"], params["msg_fc1_b"]
    w2, b2 = params["msg_fc2_w"], params["msg_fc2_b"]
    for _ in range(NUM_ROUNDS):
        x_i = jnp.broadcast_to(x[:, :, None, :], (B, S, S, D))
        x_j = jnp.broadcast_to(x[:, None, :, :], (B, S, S, D))
        pre = jnp.concatenate([x_i, x_j], axis=-1)
        m = jax.nn.relu(pre @ w1.T + b1)
        m = jax.nn.relu(m @ w2.T + b2)
        A_inp = jnp.swapaxes(A, 1, 2)
        msg = jnp.sum(A_inp[..., None] * m, axis=2)
        x = x + msg
    h = jax.nn.relu(x @ params["out_fc1_w"].T + params["out_fc1_b"])
    y = h @ params["out_fc2_w"].T
    return y[:, 0, :], y


def init_params(key, dim):
    ks = jax.random.split(key, 8)

    def uni(k, shape, fan_in):
        bound = 1.0 / math.sqrt(fan_in)
        return jax.random.uniform(k, shape, jnp.float32, -bound, bound)

    return {
        "embed": jax.random.normal(ks[0], (NUM_TOKENS, dim), jnp.float32),
        "msg_fc1_w": uni(ks[1], (dim, 2 * dim), 2 * dim),
        "msg_fc1_b": uni(ks[2], (dim,), 2 * dim),
        "msg_fc2_w": uni(ks[3], (dim, dim), dim),
        "msg_fc2_b": uni(ks[4], (dim,), dim),
        "out_fc1_w": uni(ks[5], (dim, dim), dim),
        "out_fc1_b": uni(ks[6], (dim,), dim),
        "out_fc2_w": uni(ks[7], (NUM_CLASSES, dim), dim),  # no bias
    }


if __name__ == "__main__":
    B, S, DIM = 2, 8, 32
    root = jax.random.PRNGKey(0)
    k_params, k_tok, k_adj = jax.random.split(root, 3)

    params = init_params(k_params, DIM)
    tok = jax.random.randint(k_tok, (B, S), 0, NUM_TOKENS, dtype=jnp.int32)
    A = jax.random.uniform(k_adj, (B, S, S), jnp.float32)

    out, x_full = gnn_arb_forward(tok, A, params)
    out = jax.block_until_ready(out)
    x_full = jax.block_until_ready(x_full)

    out_ref, x_full_ref = ref_forward(tok, A, params)
    assert out.shape == (B, NUM_CLASSES)
    assert x_full.shape == (B, S, NUM_CLASSES)
    assert jnp.allclose(out, out_ref, atol=1e-3, rtol=1e-3)
    assert jnp.allclose(x_full, x_full_ref, atol=1e-3, rtol=1e-3)

    print("KERNEL_OK")
</pallas_src>

<mosaic_0001>
module attributes {stable_mosaic.version = 11 : i64} {
  func.func @kernel(%arg0: i32, %arg1: memref<16x32xf32, #tpu.memory_space<vmem>>, %arg2: memref<16x128xf32, #tpu.memory_space<vmem>>, %arg3: memref<32x32xf32, #tpu.memory_space<vmem>>, %arg4: memref<32x32xf32, #tpu.memory_space<vmem>>, %arg5: memref<1x32xf32, #tpu.memory_space<vmem>>, %arg6: memref<32x32xf32, #tpu.memory_space<vmem>>, %arg7: memref<1x32xf32, #tpu.memory_space<vmem>>, %arg8: memref<32x32xf32, #tpu.memory_space<vmem>>, %arg9: memref<1x32xf32, #tpu.memory_space<vmem>>, %arg10: memref<32x128xf32, #tpu.memory_space<vmem>>, %arg11: memref<16x128xf32, #tpu.memory_space<vmem>>) attributes {dimension_semantics = [#tpu.dimension_semantics<parallel>], iteration_bounds = array<i64: 1>, scalar_prefetch = 0 : i64, scratch_operands = 0 : i64, tpu.core_type = #tpu.core_type<tc>, window_params = [{transform_indices = @transform_0, window_bounds = array<i64: 16, 32>}, {transform_indices = @transform_1, window_bounds = array<i64: 16, 128>}, {pipeline_mode = #tpu.pipeline_mode<synchronous>, transform_indices = @transform_2, window_bounds = array<i64: 32, 32>}, {pipeline_mode = #tpu.pipeline_mode<synchronous>, transform_indices = @transform_3, window_bounds = array<i64: 32, 32>}, {pipeline_mode = #tpu.pipeline_mode<synchronous>, transform_indices = @transform_4, window_bounds = array<i64: 1, 32>}, {pipeline_mode = #tpu.pipeline_mode<synchronous>, transform_indices = @transform_5, window_bounds = array<i64: 32, 32>}, {pipeline_mode = #tpu.pipeline_mode<synchronous>, transform_indices = @transform_6, window_bounds = array<i64: 1, 32>}, {pipeline_mode = #tpu.pipeline_mode<synchronous>, transform_indices = @transform_7, window_bounds = array<i64: 32, 32>}, {pipeline_mode = #tpu.pipeline_mode<synchronous>, transform_indices = @transform_8, window_bounds = array<i64: 1, 32>}, {pipeline_mode = #tpu.pipeline_mode<synchronous>, transform_indices = @transform_9, window_bounds = array<i64: 32, 128>}, {transform_indices = @transform_10, window_bounds = array<i64: 16, 128>}]} {
    %c0 = arith.constant 0 : index
    %c0_0 = arith.constant 0 : index
    %0 = vector.load %arg1[%c0, %c0_0] : memref<16x32xf32, #tpu.memory_space<vmem>>, vector<16x32xf32>
    %c0_1 = arith.constant 0 : index
    %c0_2 = arith.constant 0 : index
    %1 = vector.load %arg2[%c0_1, %c0_2] : memref<16x128xf32, #tpu.memory_space<vmem>>, vector<16x128xf32>
    %c0_3 = arith.constant 0 : index
    %c0_4 = arith.constant 0 : index
    %2 = vector.load %arg3[%c0_3, %c0_4] : memref<32x32xf32, #tpu.memory_space<vmem>>, vector<32x32xf32>
    %c0_5 = arith.constant 0 : index
    %c0_6 = arith.constant 0 : index
    %3 = vector.load %arg4[%c0_5, %c0_6] : memref<32x32xf32, #tpu.memory_space<vmem>>, vector<32x32xf32>
    %c0_7 = arith.constant 0 : index
    %c0_8 = arith.constant 0 : index
    %4 = vector.load %arg6[%c0_7, %c0_8] : memref<32x32xf32, #tpu.memory_space<vmem>>, vector<32x32xf32>
    %c0_9 = arith.constant 0 : index
    %c0_10 = arith.constant 0 : index
    %5 = vector.load %arg8[%c0_9, %c0_10] : memref<32x32xf32, #tpu.memory_space<vmem>>, vector<32x32xf32>
    %c0_11 = arith.constant 0 : index
    %c0_12 = arith.constant 0 : index
    %6 = vector.load %arg10[%c0_11, %c0_12] : memref<32x128xf32, #tpu.memory_space<vmem>>, vector<32x128xf32>
    %c0_13 = arith.constant 0 : index
    %c0_14 = arith.constant 0 : index
    %7 = vector.load %arg5[%c0_13, %c0_14] : memref<1x32xf32, #tpu.memory_space<vmem>>, vector<1x32xf32>
    %8 = vector.shape_cast %7 : vector<1x32xf32> to vector<1x32xf32>
    %9 = vector.broadcast %8 : vector<1x32xf32> to vector<16x32xf32>
    %c0_15 = arith.constant 0 : index
    %c0_16 = arith.constant 0 : index
    %10 = vector.load %arg7[%c0_15, %c0_16] : memref<1x32xf32, #tpu.memory_space<vmem>>, vector<1x32xf32>
    %11 = vector.shape_cast %10 : vector<1x32xf32> to vector<1x32xf32>
    %12 = vector.broadcast %11 : vector<1x32xf32> to vector<128x32xf32>
    %c0_17 = arith.constant 0 : index
    %c0_18 = arith.constant 0 : index
    %13 = vector.load %arg9[%c0_17, %c0_18] : memref<1x32xf32, #tpu.memory_space<vmem>>, vector<1x32xf32>
    %14 = vector.shape_cast %13 : vector<1x32xf32> to vector<1x32xf32>
    %15 = vector.broadcast %14 : vector<1x32xf32> to vector<16x32xf32>
    %c0_i32 = arith.constant 0 : i32
    %cst = arith.constant dense<0.000000e+00> : vector<16x32xf32>
    %16 = tpu.matmul %0, %2, %cst {dimension_numbers = #tpu.dot_dimension_numbers<[1], [0], [0], [1], [0, 0, 1, 1], [], []>} : vector<16x32xf32>, vector<32x32xf32>, vector<16x32xf32> -> vector<16x32xf32>
    %17 = arith.addf %16, %9 : vector<16x32xf32>
    %cst_19 = arith.constant dense<0.000000e+00> : vector<16x32xf32>
    %18 = tpu.matmul %0, %3, %cst_19 {dimension_numbers = #tpu.dot_dimension_numbers<[1], [0], [0], [1], [0, 0, 1, 1], [], []>} : vector<16x32xf32>, vector<32x32xf32>, vector<16x32xf32> -> vector<16x32xf32>
    %19 = vector.shape_cast %18 : vector<16x32xf32> to vector<2x1x8x32xf32>
    %20 = vector.shape_cast %19 : vector<2x1x8x32xf32> to vector<2x1x8x32xf32>
    %21 = vector.broadcast %20 : vector<2x1x8x32xf32> to vector<2x8x8x32xf32>
    %22 = vector.shape_cast %21 : vector<2x8x8x32xf32> to vector<16x8x32xf32>
    %23 = vector.shape_cast %17 : vector<16x32xf32> to vector<16x1x32xf32>
    %24 = vector.broadcast %23 : vector<16x1x32xf32> to vector<16x8x32xf32>
    %25 = arith.addf %24, %22 : vector<16x8x32xf32>
    %cst_20 = arith.constant 0.000000e+00 : f32
    %26 = vector.broadcast %cst_20 : f32 to vector<16x8x32xf32>
    %27 = arith.maximumf %25, %26 : vector<16x8x32xf32>
    %28 = vector.shape_cast %27 : vector<16x8x32xf32> to vector<128x32xf32>
    %cst_21 = arith.constant dense<0.000000e+00> : vector<128x32xf32>
    %29 = tpu.matmul %28, %4, %cst_21 {dimension_numbers = #tpu.dot_dimension_numbers<[1], [0], [0], [1], [0, 0, 1, 1], [], []>} : vector<128x32xf32>, vector<32x32xf32>, vector<128x32xf32> -> vector<128x32xf32>
    %30 = arith.addf %29, %12 : vector<128x32xf32>
    %cst_22 = arith.constant 0.000000e+00 : f32
    %31 = vector.broadcast %cst_22 : f32 to vector<128x32xf32>
    %32 = arith.maximumf %30, %31 : vector<128x32xf32>
    %cst_23 = arith.constant dense<0.000000e+00> : vector<16x32xf32>
    %33 = tpu.matmul %1, %32, %cst_23 {dimension_numbers = #tpu.dot_dimension_numbers<[1], [0], [0], [1], [0, 0, 1, 1], [], []>} : vector<16x128xf32>, vector<128x32xf32>, vector<16x32xf32> -> vector<16x32xf32>
    %34 = arith.addf %0, %33 : vector<16x32xf32>
    %c1_i32 = arith.constant 1 : i32
    %cst_24 = arith.constant dense<0.000000e+00> : vector<16x32xf32>
    %35 = tpu.matmul %34, %2, %cst_24 {dimension_numbers = #tpu.dot_dimension_numbers<[1], [0], [0], [1], [0, 0, 1, 1], [], []>} : vector<16x32xf32>, vector<32x32xf32>, vector<16x32xf32> -> vector<16x32xf32>
    %36 = arith.addf %35, %9 : vector<16x32xf32>
    %cst_25 = arith.constant dense<0.000000e+00> : vector<16x32xf32>
    %37 = tpu.matmul %34, %3, %cst_25 {dimension_numbers = #tpu.dot_dimension_numbers<[1], [0], [0], [1], [0, 0, 1, 1], [], []>} : vector<16x32xf32>, vector<32x32xf32>, vector<16x32xf32> -> vector<16x32xf32>
    %38 = vector.shape_cast %37 : vector<16x32xf32> to vector<2x1x8x32xf32>
    %39 = vector.shape_cast %38 : vector<2x1x8x32xf32> to vector<2x1x8x32xf32>
    %40 = vector.broadcast %39 : vector<2x1x8x32xf32> to vector<2x8x8x32xf32>
    %41 = vector.shape_cast %40 : vector<2x8x8x32xf32> to vector<16x8x32xf32>
    %42 = vector.shape_cast %36 : vector<16x32xf32> to vector<16x1x32xf32>
    %43 = vector.broadcast %42 : vector<16x1x32xf32> to vector<16x8x32xf32>
    %44 = arith.addf %43, %41 : vector<16x8x32xf32>
    %cst_26 = arith.constant 0.000000e+00 : f32
    %45 = vector.broadcast %cst_26 : f32 to vector<16x8x32xf32>
    %46 = arith.maximumf %44, %45 : vector<16x8x32xf32>
    %47 = vector.shape_cast %46 : vector<16x8x32xf32> to vector<128x32xf32>
    %cst_27 = arith.constant dense<0.000000e+00> : vector<128x32xf32>
    %48 = tpu.matmul %47, %4, %cst_27 {dimension_numbers = #tpu.dot_dimension_numbers<[1], [0], [0], [1], [0, 0, 1, 1], [], []>} : vector<128x32xf32>, vector<32x32xf32>, vector<128x32xf32> -> vector<128x32xf32>
    %49 = arith.addf %48, %12 : vector<128x32xf32>
    %cst_28 = arith.constant 0.000000e+00 : f32
    %50 = vector.broadcast %cst_28 : f32 to vector<128x32xf32>
    %51 = arith.maximumf %49, %50 : vector<128x32xf32>
    %cst_29 = arith.constant dense<0.000000e+00> : vector<16x32xf32>
    %52 = tpu.matmul %1, %51, %cst_29 {dimension_numbers = #tpu.dot_dimension_numbers<[1], [0], [0], [1], [0, 0, 1, 1], [], []>} : vector<16x128xf32>, vector<128x32xf32>, vector<16x32xf32> -> vector<16x32xf32>
    %53 = arith.addf %34, %52 : vector<16x32xf32>
    %c2_i32 = arith.constant 2 : i32
    %cst_30 = arith.constant dense<0.000000e+00> : vector<16x32xf32>
    %54 = tpu.matmul %53, %2, %cst_30 {dimension_numbers = #tpu.dot_dimension_numbers<[1], [0], [0], [1], [0, 0, 1, 1], [], []>} : vector<16x32xf32>, vector<32x32xf32>, vector<16x32xf32> -> vector<16x32xf32>
    %55 = arith.addf %54, %9 : vector<16x32xf32>
    %cst_31 = arith.constant dense<0.000000e+00> : vector<16x32xf32>
    %56 = tpu.matmul %53, %3, %cst_31 {dimension_numbers = #tpu.dot_dimension_numbers<[1], [0], [0], [1], [0, 0, 1, 1], [], []>} : vector<16x32xf32>, vector<32x32xf32>, vector<16x32xf32> -> vector<16x32xf32>
    %57 = vector.shape_cast %56 : vector<16x32xf32> to vector<2x1x8x32xf32>
    %58 = vector.shape_cast %57 : vector<2x1x8x32xf32> to vector<2x1x8x32xf32>
    %59 = vector.broadcast %58 : vector<2x1x8x32xf32> to vector<2x8x8x32xf32>
    %60 = vector.shape_cast %59 : vector<2x8x8x32xf32> to vector<16x8x32xf32>
    %61 = vector.shape_cast %55 : vector<16x32xf32> to vector<16x1x32xf32>
    %62 = vector.broadcast %61 : vector<16x1x32xf32> to vector<16x8x32xf32>
    %63 = arith.addf %62, %60 : vector<16x8x32xf32>
    %cst_32 = arith.constant 0.000000e+00 : f32
    %64 = vector.broadcast %cst_32 : f32 to vector<16x8x32xf32>
    %65 = arith.maximumf %63, %64 : vector<16x8x32xf32>
    %66 = vector.shape_cast %65 : vector<16x8x32xf32> to vector<128x32xf32>
    %cst_33 = arith.constant dense<0.000000e+00> : vector<128x32xf32>
    %67 = tpu.matmul %66, %4, %cst_33 {dimension_numbers = #tpu.dot_dimension_numbers<[1], [0], [0], [1], [0, 0, 1, 1], [], []>} : vector<128x32xf32>, vector<32x32xf32>, vector<128x32xf32> -> vector<128x32xf32>
    %68 = arith.addf %67, %12 : vector<128x32xf32>
    %cst_34 = arith.constant 0.000000e+00 : f32
    %69 = vector.broadcast %cst_34 : f32 to vector<128x32xf32>
    %70 = arith.maximumf %68, %69 : vector<128x32xf32>
    %cst_35 = arith.constant dense<0.000000e+00> : vector<16x32xf32>
    %71 = tpu.matmul %1, %70, %cst_35 {dimension_numbers = #tpu.dot_dimension_numbers<[1], [0], [0], [1], [0, 0, 1, 1], [], []>} : vector<16x128xf32>, vector<128x32xf32>, vector<16x32xf32> -> vector<16x32xf32>
    %72 = arith.addf %53, %71 : vector<16x32xf32>
    %c3_i32 = arith.constant 3 : i32
    %cst_36 = arith.constant dense<0.000000e+00> : vector<16x32xf32>
    %73 = tpu.matmul %72, %2, %cst_36 {dimension_numbers = #tpu.dot_dimension_numbers<[1], [0], [0], [1], [0, 0, 1, 1], [], []>} : vector<16x32xf32>, vector<32x32xf32>, vector<16x32xf32> -> vector<16x32xf32>
    %74 = arith.addf %73, %9 : vector<16x32xf32>
    %cst_37 = arith.constant dense<0.000000e+00> : vector<16x32xf32>
    %75 = tpu.matmul %72, %3, %cst_37 {dimension_numbers = #tpu.dot_dimension_numbers<[1], [0], [0], [1], [0, 0, 1, 1], [], []>} : vector<16x32xf32>, vector<32x32xf32>, vector<16x32xf32> -> vector<16x32xf32>
    %76 = vector.shape_cast %75 : vector<16x32xf32> to vector<2x1x8x32xf32>
    %77 = vector.shape_cast %76 : vector<2x1x8x32xf32> to vector<2x1x8x32xf32>
    %78 = vector.broadcast %77 : vector<2x1x8x32xf32> to vector<2x8x8x32xf32>
    %79 = vector.shape_cast %78 : vector<2x8x8x32xf32> to vector<16x8x32xf32>
    %80 = vector.shape_cast %74 : vector<16x32xf32> to vector<16x1x32xf32>
    %81 = vector.broadcast %80 : vector<16x1x32xf32> to vector<16x8x32xf32>
    %82 = arith.addf %81, %79 : vector<16x8x32xf32>
    %cst_38 = arith.constant 0.000000e+00 : f32
    %83 = vector.broadcast %cst_38 : f32 to vector<16x8x32xf32>
    %84 = arith.maximumf %82, %83 : vector<16x8x32xf32>
    %85 = vector.shape_cast %84 : vector<16x8x32xf32> to vector<128x32xf32>
    %cst_39 = arith.constant dense<0.000000e+00> : vector<128x32xf32>
    %86 = tpu.matmul %85, %4, %cst_39 {dimension_numbers = #tpu.dot_dimension_numbers<[1], [0], [0], [1], [0, 0, 1, 1], [], []>} : vector<128x32xf32>, vector<32x32xf32>, vector<128x32xf32> -> vector<128x32xf32>
    %87 = arith.addf %86, %12 : vector<128x32xf32>
    %cst_40 = arith.constant 0.000000e+00 : f32
    %88 = vector.broadcast %cst_40 : f32 to vector<128x32xf32>
    %89 = arith.maximumf %87, %88 : vector<128x32xf32>
    %cst_41 = arith.constant dense<0.000000e+00> : vector<16x32xf32>
    %90 = tpu.matmul %1, %89, %cst_41 {dimension_numbers = #tpu.dot_dimension_numbers<[1], [0], [0], [1], [0, 0, 1, 1], [], []>} : vector<16x128xf32>, vector<128x32xf32>, vector<16x32xf32> -> vector<16x32xf32>
    %91 = arith.addf %72, %90 : vector<16x32xf32>
    %c4_i32 = arith.constant 4 : i32
    %cst_42 = arith.constant dense<0.000000e+00> : vector<16x32xf32>
    %92 = tpu.matmul %91, %2, %cst_42 {dimension_numbers = #tpu.dot_dimension_numbers<[1], [0], [0], [1], [0, 0, 1, 1], [], []>} : vector<16x32xf32>, vector<32x32xf32>, vector<16x32xf32> -> vector<16x32xf32>
    %93 = arith.addf %92, %9 : vector<16x32xf32>
    %cst_43 = arith.constant dense<0.000000e+00> : vector<16x32xf32>
    %94 = tpu.matmul %91, %3, %cst_43 {dimension_numbers = #tpu.dot_dimension_numbers<[1], [0], [0], [1], [0, 0, 1, 1], [], []>} : vector<16x32xf32>, vector<32x32xf32>, vector<16x32xf32> -> vector<16x32xf32>
    %95 = vector.shape_cast %94 : vector<16x32xf32> to vector<2x1x8x32xf32>
    %96 = vector.shape_cast %95 : vector<2x1x8x32xf32> to vector<2x1x8x32xf32>
    %97 = vector.broadcast %96 : vector<2x1x8x32xf32> to vector<2x8x8x32xf32>
    %98 = vector.shape_cast %97 : vector<2x8x8x32xf32> to vector<16x8x32xf32>
    %99 = vector.shape_cast %93 : vector<16x32xf32> to vector<16x1x32xf32>
    %100 = vector.broadcast %99 : vector<16x1x32xf32> to vector<16x8x32xf32>
    %101 = arith.addf %100, %98 : vector<16x8x32xf32>
    %cst_44 = arith.constant 0.000000e+00 : f32
    %102 = vector.broadcast %cst_44 : f32 to vector<16x8x32xf32>
    %103 = arith.maximumf %101, %102 : vector<16x8x32xf32>
    %104 = vector.shape_cast %103 : vector<16x8x32xf32> to vector<128x32xf32>
    %cst_45 = arith.constant dense<0.000000e+00> : vector<128x32xf32>
    %105 = tpu.matmul %104, %4, %cst_45 {dimension_numbers = #tpu.dot_dimension_numbers<[1], [0], [0], [1], [0, 0, 1, 1], [], []>} : vector<128x32xf32>, vector<32x32xf32>, vector<128x32xf32> -> vector<128x32xf32>
    %106 = arith.addf %105, %12 : vector<128x32xf32>
    %cst_46 = arith.constant 0.000000e+00 : f32
    %107 = vector.broadcast %cst_46 : f32 to vector<128x32xf32>
    %108 = arith.maximumf %106, %107 : vector<128x32xf32>
    %cst_47 = arith.constant dense<0.000000e+00> : vector<16x32xf32>
    %109 = tpu.matmul %1, %108, %cst_47 {dimension_numbers = #tpu.dot_dimension_numbers<[1], [0], [0], [1], [0, 0, 1, 1], [], []>} : vector<16x128xf32>, vector<128x32xf32>, vector<16x32xf32> -> vector<16x32xf32>
    %110 = arith.addf %91, %109 : vector<16x32xf32>
    %cst_48 = arith.constant dense<0.000000e+00> : vector<16x32xf32>
    %111 = tpu.matmul %110, %5, %cst_48 {dimension_numbers = #tpu.dot_dimension_numbers<[1], [0], [0], [1], [0, 0, 1, 1], [], []>} : vector<16x32xf32>, vector<32x32xf32>, vector<16x32xf32> -> vector<16x32xf32>
    %112 = arith.addf %111, %15 : vector<16x32xf32>
    %cst_49 = arith.constant 0.000000e+00 : f32
    %113 = vector.broadcast %cst_49 : f32 to vector<16x32xf32>
    %114 = arith.maximumf %112, %113 : vector<16x32xf32>
    %cst_50 = arith.constant dense<0.000000e+00> : vector<16x128xf32>
    %115 = tpu.matmul %114, %6, %cst_50 {dimension_numbers = #tpu.dot_dimension_numbers<[1], [0], [0], [1], [0, 0, 1, 1], [], []>} : vector<16x32xf32>, vector<32x128xf32>, vector<16x128xf32> -> vector<16x128xf32>
    %c0_51 = arith.constant 0 : index
    %c0_52 = arith.constant 0 : index
    %116 = vector.load %arg11[%c0_51, %c0_52] : memref<16x128xf32, #tpu.memory_space<vmem>>, vector<16x128xf32>
    tpu.vector_store %arg11[%c0_51, %c0_52], %115 {strides = array<i32>} : memref<16x128xf32, #tpu.memory_space<vmem>>, vector<16x128xf32>,
    return
  }
  func.func @transform_0(%arg0: i32) -> (i32, i32) {
    %c0_i32 = arith.constant 0 : i32
    %c0_i32_0 = arith.constant 0 : i32
    return %arg0, %c0_i32 : i32, i32
  }
  func.func @transform_1(%arg0: i32) -> (i32, i32) {
    %c0_i32 = arith.constant 0 : i32
    %c0_i32_0 = arith.constant 0 : i32
    return %arg0, %c0_i32 : i32, i32
  }
  func.func @transform_2(%arg0: i32) -> (i32, i32) {
    %c0_i32 = arith.constant 0 : i32
    %c0_i32_0 = arith.constant 0 : i32
    %c0_i32_1 = arith.constant 0 : i32
    return %c0_i32, %c0_i32_0 : i32, i32
  }
  func.func @transform_3(%arg0: i32) -> (i32, i32) {
    %c0_i32 = arith.constant 0 : i32
    %c0_i32_0 = arith.constant 0 : i32
    %c0_i32_1 = arith.constant 0 : i32
    return %c0_i32, %c0_i32_0 : i32, i32
  }
  func.func @transform_4(%arg0: i32) -> (i32, i32) {
    %c0_i32 = arith.constant 0 : i32
    %c0_i32_0 = arith.constant 0 : i32
    %c0_i32_1 = arith.constant 0 : i32
    return %c0_i32, %c0_i32_0 : i32, i32
  }
  func.func @transform_5(%arg0: i32) -> (i32, i32) {
    %c0_i32 = arith.constant 0 : i32
    %c0_i32_0 = arith.constant 0 : i32
    %c0_i32_1 = arith.constant 0 : i32
    return %c0_i32, %c0_i32_0 : i32, i32
  }
  func.func @transform_6(%arg0: i32) -> (i32, i32) {
    %c0_i32 = arith.constant 0 : i32
    %c0_i32_0 = arith.constant 0 : i32
    %c0_i32_1 = arith.constant 0 : i32
    return %c0_i32, %c0_i32_0 : i32, i32
  }
  func.func @transform_7(%arg0: i32) -> (i32, i32) {
    %c0_i32 = arith.constant 0 : i32
    %c0_i32_0 = arith.constant 0 : i32
    %c0_i32_1 = arith.constant 0 : i32
    return %c0_i32, %c0_i32_0 : i32, i32
  }
  func.func @transform_8(%arg0: i32) -> (i32, i32) {
    %c0_i32 = arith.constant 0 : i32
    %c0_i32_0 = arith.constant 0 : i32
    %c0_i32_1 = arith.constant 0 : i32
    return %c0_i32, %c0_i32_0 : i32, i32
  }
  func.func @transform_9(%arg0: i32) -> (i32, i32) {
    %c0_i32 = arith.constant 0 : i32
    %c0_i32_0 = arith.constant 0 : i32
    %c0_i32_1 = arith.constant 0 : i32
    return %c0_i32, %c0_i32_0 : i32, i32
  }
  func.func @transform_10(%arg0: i32) -> (i32, i32) {
    %c0_i32 = arith.constant 0 : i32
    %c0_i32_0 = arith.constant 0 : i32
    return %arg0, %c0_i32 : i32, i32
  }
}

</mosaic_0001>

<bundles_post_ra>
// kernel: tpu_custom_call.1
= control target key start
LH: loop header
LB: loop body
LE: loop exit
PB: predicated region body
PF: predicated region fallthrough
CT: control target
= control target key end

     0   :  { %15 = vsyncpa [#allocation3], 0  ;;  %s2555_s0 = inlined_call_operand.hbm [shape: f32[16,32], index: 0, kind: input, shape index: {}]   ;;  %s2556_s1 = inlined_call_operand.hbm [shape: f32[16,128], index: 1, kind: input, shape index: {}]   ;;  %s2557_s2 = inlined_call_operand.hbm [shape: f32[32,32], index: 2, kind: input, shape index: {}]   ;;  %s2558_s3 = inlined_call_operand.hbm [shape: f32[32,32], index: 3, kind: input, shape index: {}]   ;;  %s2559_s4 = inlined_call_operand.vmem [shape: f32[1,32], index: 4, kind: input, shape index: {}]   ;;  %s2560_s5 = inlined_call_operand.hbm [shape: f32[32,32], index: 5, kind: input, shape index: {}]   ;;  %s2561_s6 = inlined_call_operand.vmem [shape: f32[1,32], index: 6, kind: input, shape index: {}]   ;;  %s2562_s7 = inlined_call_operand.hbm [shape: f32[32,32], index: 7, kind: input, shape index: {}]   ;;  %s2563_s8 = inlined_call_operand.vmem [shape: f32[1,32], index: 8, kind: input, shape index: {}]   ;;  %s2564_s9 = inlined_call_operand.hbm [shape: f32[32,128], index: 9, kind: input, shape index: {}]   ;;  %s2565_s10 = inlined_call_operand.hbm [shape: f32[16,128], index: 10, kind: output, shape index: {}]  }
   0x1   :  { %16 = vsyncpa [#allocation6], 0 }
   0x2   :  { %17 = vsyncpa [#allocation9], 0 }
   0x3   :  { %18 = vsyncpa [#allocation12], 0 }
   0x4   :  { %19 = vsyncpa [#allocation4], 0  ;;  %s37_s15 = sshll.u32 %s2556_s1, 4  ;;  %s2031_s16 = smov [#allocation5]   ;;  %s38_s15 = int_to_ptr.hbm [resolvable:$true] %s37_s15 }
   0x5   :  { %s39_s17 = sshll.u32 %s2031_s16, 4  ;;  %s63_s20 = sshll.u32 %s2558_s3, 4  ;;  %s40_s17 = int_to_ptr.vmem [resolvable:$true] %s39_s17  ;;  %s64_s20 = int_to_ptr.hbm [resolvable:$true] %s63_s20 }
   0x6   :  { %s2032_s21 = smov 128   ;;  %s2033_s22 = smov 8  }
   0x7   :  { %45 = dma.hbm_to_vmem [thread:$0]  %s38_s15, 256, %s40_s17, [#allocation6], %s2032_s21, %s2032_s21, %s2033_s22  }
   0x8   :  { %s2034_s23 = smov [#allocation8]   ;;  %s93_s1 = sshll.u32 %s2562_s7, 4  ;;  %s94_s1 = int_to_ptr.hbm [resolvable:$true] %s93_s1 }
   0x9   :  { %s65_s24 = sshll.u32 %s2034_s23, 4  ;;  %s24_s28 = sshll.u32 %s2555_s0, 4  ;;  %s66_s24 = int_to_ptr.vmem [resolvable:$true] %s65_s24  ;;  %s25_s28 = int_to_ptr.hbm [resolvable:$true] %s24_s28 }
   0xa   :  { %71 = dma.hbm_to_vmem [thread:$0]  %s64_s20, 512, %s66_s24, [#allocation9], %s2032_s21, %s2032_s21, %s2033_s22  }
   0xb   :  { %s2035_s29 = smov [#allocation11]   ;;  %s2036_s11 = smov [#allocation2]  }
   0xc   :  { %s95_s30 = sshll.u32 %s2035_s29, 4  ;;  %s26_s7 = sshll.u32 %s2036_s11, 4  ;;  %s96_s30 = int_to_ptr.vmem [resolvable:$true] %s95_s30  ;;  %s27_s7 = int_to_ptr.vmem [resolvable:$true] %s26_s7 }
   0xd   :  { %101 = dma.hbm_to_vmem [thread:$0]  %s94_s1, 512, %s96_s30, [#allocation12], %s2032_s21, %s2032_s21, %s2033_s22  }
   0xe   :  { %s50_s14 = sshll.u32 %s2557_s2, 4  ;;  %s78_s16 = sshll.u32 %s2560_s5, 4  ;;  %s51_s14 = int_to_ptr.hbm [resolvable:$true] %s50_s14  ;;  %s79_s16 = int_to_ptr.hbm [resolvable:$true] %s78_s16 }
   0xf   :  { %32 = dma.hbm_to_vmem [thread:$0]  %s25_s28, 256, %s27_s7, [#allocation3], %s2032_s21, %s2032_s21, %s2033_s22  }
  0x10   :  { %s2037_s17 = smov [#allocation7]   ;;  %s2038_s19 = smov [#allocation10]  }
  0x11   :  { %s52_s18 = sshll.u32 %s2037_s17, 4  ;;  %s80_s2 = sshll.u32 %s2038_s19, 4  ;;  %s53_s18 = int_to_ptr.vmem [resolvable:$true] %s52_s18  ;;  %s81_s2 = int_to_ptr.vmem [resolvable:$true] %s80_s2 }
  0x12   :  { %58 = dma.hbm_to_vmem [thread:$0]  %s51_s14, 512, %s53_s18, [#allocation6], %s2032_s21, %s2032_s21, %s2033_s22  }
  0x13   :  { %s108_s24 = sshll.u32 %s2564_s9, 4  ;;  %s2039_s5 = smov [#allocation13]   ;;  %s109_s24 = int_to_ptr.hbm [resolvable:$true] %s108_s24 }
  0x14   :  { %86 = dma.hbm_to_vmem [thread:$0]  %s79_s16, 512, %s81_s2, [#allocation9], %s2032_s21, %s2032_s21, %s2033_s22  }
  0x15   :  { %s110_s25 = sshll.u32 %s2039_s5, 4  ;;  %s111_s25 = int_to_ptr.vmem [resolvable:$true] %s110_s25 }
  0x16   :  { %116 = dma.hbm_to_vmem [thread:$0]  %s109_s24, 512, %s111_s25, [#allocation12], %s2032_s21, %s2032_s21, %s2033_s22  }
  0x17   :  { %2021 = dma.done.wait [#allocation3], 256  }
  0x18   :  { %2022 = vsyncadd [#allocation3], 4294967040 }
  0x19   :  { %2023 = dma.done.wait [#allocation6], 768  }
  0x1a   :  { %2024 = vsyncadd [#allocation6], 4294966528 }
  0x1b   :  { %2025 = dma.done.wait [#allocation9], 1024  }
  0x1c   :  { %2026 = vsyncadd [#allocation9], 4294966272 }
  0x1d   :  { %2027 = dma.done.wait [#allocation12], 1024  }
  0x1e   :  { %2028 = vsyncadd [#allocation12], 4294966272  ;;  %v2138_v0 = vld [vmem:[#allocation7 + $0x18] sm:$0xff]  ;;  %v2141_v1 = vld [vmem:[#allocation7 + $0x10] sm:$0xff]  ;;  %vm181_vm0 = vcmask 261120   ;;  %s2040_s11 = smov [#allocation14]  }
  0x1f   :  { %200 = vmatpush.msra.mxu0 %v2138_v0  ;;  %v2143_v2 = vld [vmem:[#allocation8 + $0x18] sm:$0xff]  ;;  %v2145_v3 = vld [vmem:[#allocation7 + $0x8] sm:$0xff]  ;;  %v2148_v4 = vld [vmem:[#allocation8 + $0x10] sm:$0xff]  ;;  %s1678_s7 = sshll.u32 %s2040_s11, 4  ;;  %s1680_s14 = sshll.u32 %s2565_s10, 4  ;;  %s1679_s7 = int_to_ptr.vmem [resolvable:$true] %s1678_s7  ;;  %s1681_s14 = int_to_ptr.hbm [resolvable:$true] %s1680_s14 }
  0x20   :  { %223 = vmatpush.msra.mxu1 %v2143_v2  ;;  %v2151_v5 = vld [vmem:[#allocation8 + $0x8] sm:$0xff]  ;;  %v2153_v6 = vld [vmem:[#allocation7] sm:$0xff]  ;;  %v2182_v10 = vld [vmem:[#allocation10 + $0x18] sm:$0xff] }
  0x21   :  { %201 = vmatpush.msra.mxu0 %v2141_v1  ;;  %v2157_v7 = vld [vmem:[#allocation2] sm:$0xff]  ;;  %v2172_v9 = vld [vmem:[#allocation2 + $0x8] sm:$0xff]  ;;  %v2184_v11 = vld [vmem:[#allocation10 + $0x10] sm:$0xff]  ;;  %374 = vmatpush.msra.mxu2 %v2182_v10 }
  0x22   :  { %224 = vmatpush.msra.mxu1 %v2148_v4  ;;  %v2159_v8 = vld [vmem:[#allocation8] sm:$0xff]  ;;  %v2188_v12 = vld [vmem:[#allocation10 + $0x8] sm:$0xff] }
  0x23   :  { %202 = vmatpush.msra.mxu0 %v2145_v3  ;;  %375 = vmatpush.msra.mxu2 %v2184_v11  ;;  %v2193_v13 = vld [vmem:[#allocation10] sm:$0xff] }
  0x24   :  { %225 = vmatpush.msra.mxu1 %v2151_v5  ;;  %v2209_v14 = vld [vmem:[%s2559_s4] ss:$0 sm:$0xff] }
  0x25   :  { %203 = vmatpush.msra.mxu0 %v2153_v6  ;;  %376 = vmatpush.msra.mxu2 %v2188_v12 }
  0x26   :  { %1696 = vmatmul.msk.f32.vlgmr.msra.gmra.mxu0 %vm181_vm0, %v2157_v7  ;;  %226 = vmatpush.msra.mxu1 %v2159_v8 }
  0x27   :  { %1698 = vmatmul.msk.f32.vlgmr.msra.gmra.mxu1 %vm181_vm0, %v2157_v7  ;;  %486 = vmatpush.msrb.mxu0 %v2138_v0 }
  0x28   :  { %509 = vmatpush.msrb.mxu1 %v2143_v2  ;;  %377 = vmatpush.msra.mxu2 %v2193_v13 }
  0x29   :  { %487 = vmatpush.msrb.mxu0 %v2141_v1 }
  0x2a   :  { %510 = vmatpush.msrb.mxu1 %v2148_v4  ;;  %1232 = vmatpush.msrb.mxu2 %v2182_v10 }
  0x2b   :  { %488 = vmatpush.msrb.mxu0 %v2145_v3 }
  0x2c   :  { %511 = vmatpush.msrb.mxu1 %v2151_v5  ;;  %1233 = vmatpush.msrb.mxu2 %v2184_v11 }
  0x2d   :  { %489 = vmatpush.msrb.mxu0 %v2153_v6 }
  0x2e   :  { %1697 = vmatmul.msk.f32.gmra.mxu0 %vm181_vm0, %v2172_v9  ;;  %512 = vmatpush.msrb.mxu1 %v2159_v8 }
  0x2f   :  { %1699 = vmatmul.msk.f32.gmra.mxu1 %vm181_vm0, %v2172_v9  ;;  %660 = vmatpush.msra.mxu0 %v2182_v10 }
  0x30   :  { %1800 = vmatpush.msra.mxu1 %v2182_v10  ;;  %1234 = vmatpush.msrb.mxu2 %v2188_v12 }
  0x31   :  { %661 = vmatpush.msra.mxu0 %v2184_v11 }
  0x32   :  { %1801 = vmatpush.msra.mxu1 %v2184_v11  ;;  %1235 = vmatpush.msrb.mxu2 %v2193_v13 }
  0x33   :  { %662 = vmatpush.msra.mxu0 %v2188_v12 }
  0x34   :  { %1802 = vmatpush.msra.mxu1 %v2188_v12 }
  0x35   :  { %663 = vmatpush.msra.mxu0 %v2193_v13 }
  0x36   :  { %1803 = vmatpush.msra.mxu1 %v2193_v13 }
  0xa3   :  { %v205_v15 = vpop.f32.mrf.mxu0 }
  0xa4   :  { %v206_v16 = vadd.f32 %v2209_v14, %v205_v15  ;;  %v228_v17 = vpop.f32.mrf.mxu1 }
  0xa6   :  { %v250_v18 = vperm.slane %v206_v16, 0  ;;  %v236_v19 = vrot.slane %v206_v16, 1  ;;  %v237_v24 = vrot.slane %v206_v16, 2  ;;  %v238_v28 = vrot.slane %v206_v16, 3 }
  0xa7   :  { %v239_v32 = vrot.slane %v206_v16, 4  ;;  %v240_v36 = vrot.slane %v206_v16, 5  ;;  %v241_v40 = vrot.slane %v206_v16, 6  ;;  %v242_v44 = vrot.slane %v206_v16, 7 }
  0xa8   :  { %v282_v20 = vadd.f32 %v250_v18, %v228_v17  ;;  %v251_v22 = vperm.slane %v236_v19, 0  ;;  %v252_v26 = vperm.slane %v237_v24, 0  ;;  %v253_v30 = vperm.slane %v238_v28, 0 }
  0xa9   :  { %v254_v34 = vperm.slane %v239_v32, 0  ;;  %v255_v38 = vperm.slane %v240_v36, 0  ;;  %v256_v42 = vperm.slane %v241_v40, 0  ;;  %v257_v46 = vperm.slane %v242_v44, 0 }
  0xaa   :  { %v298_v21 = vmax.f32 %v282_v20, 0.0  ;;  %v283_v23 = vadd.f32 %v251_v22, %v228_v17  ;;  %v284_v27 = vadd.f32 %v252_v26, %v228_v17  ;;  %v285_v31 = vadd.f32 %v253_v30, %v228_v17 }
  0xab   :  { %v286_v35 = vadd.f32 %v254_v34, %v228_v17  ;;  %v287_v39 = vadd.f32 %v255_v38, %v228_v17  ;;  %v288_v43 = vadd.f32 %v256_v42, %v228_v17  ;;  %v208_v47 = vpop.f32.mrf.mxu0  ;;  %v289_v49 = vadd.f32 %v257_v46, %v228_v17 }
  0xac   :  { %1700 = vmatmul.msk.f32.vlgmr.msra.gmra.mxu2 %vm181_vm0, %v298_v21  ;;  %v299_v25 = vmax.f32 %v283_v23, 0.0  ;;  %v300_v29 = vmax.f32 %v284_v27, 0.0  ;;  %v301_v33 = vmax.f32 %v285_v31, 0.0  ;;  %v209_v48 = vadd.f32 %v2209_v14, %v208_v47  ;;  %v231_v51 = vpop.f32.mrf.mxu1 }
  0xad   :  { %v302_v37 = vmax.f32 %v286_v35, 0.0  ;;  %v303_v41 = vmax.f32 %v287_v39, 0.0  ;;  %v304_v45 = vmax.f32 %v288_v43, 0.0  ;;  %v305_v52 = vmax.f32 %v289_v49, 0.0  ;;  %v2232_v49 = vld [vmem:[%s2561_s6] ss:$0 sm:$0xff] }
  0xae   :  { %v258_v50 = vperm.slane %v209_v48, 0  ;;  %v243_v54 = vrot.slane %v209_v48, 1  ;;  %v244_v58 = vrot.slane %v209_v48, 2  ;;  %v245_v62 = vrot.slane %v209_v48, 3 }
  0xaf   :  { %v246_v17 = vrot.slane %v209_v48, 4  ;;  %v247_v21 = vrot.slane %v209_v48, 5 }
  0xb0   :  { %v290_v53 = vadd.f32 %v258_v50, %v231_v51  ;;  %v259_v56 = vperm.slane %v243_v54, 0  ;;  %v260_v60 = vperm.slane %v244_v58, 0  ;;  %v261_v15 = vperm.slane %v245_v62, 0 }
  0xb1   :  { %v262_v19 = vperm.slane %v246_v17, 0  ;;  %v263_v23 = vperm.slane %v247_v21, 0 }
  0xb2   :  { %v306_v55 = vmax.f32 %v290_v53, 0.0  ;;  %v291_v57 = vadd.f32 %v259_v56, %v231_v51  ;;  %v292_v61 = vadd.f32 %v260_v60, %v231_v51  ;;  %v293_v16 = vadd.f32 %v261_v15, %v231_v51 }
  0xb3   :  { %v294_v20 = vadd.f32 %v262_v19, %v231_v51  ;;  %v295_v24 = vadd.f32 %v263_v23, %v231_v51 }
  0xb4   :  { %1701 = vmatmul.msk.f32.gmra.mxu2 %vm181_vm0, %v299_v25  ;;  %v307_v59 = vmax.f32 %v291_v57, 0.0  ;;  %v308_v63 = vmax.f32 %v292_v61, 0.0  ;;  %v309_v18 = vmax.f32 %v293_v16, 0.0  ;;  %v248_v25 = vrot.slane %v209_v48, 6 }
  0xb5   :  { %v310_v22 = vmax.f32 %v294_v20, 0.0  ;;  %v311_v26 = vmax.f32 %v295_v24, 0.0 }
  0xb6   :  { %v264_v27 = vperm.slane %v248_v25, 0 }
  0xb8   :  { %v296_v28 = vadd.f32 %v264_v27, %v231_v51 }
  0xba   :  { %v312_v30 = vmax.f32 %v296_v28, 0.0 }
  0xbc   :  { %1702 = vmatmul.msk.f32.gmra.mxu2 %vm181_vm0, %v300_v29  ;;  %v249_v29 = vrot.slane %v209_v48, 7 }
  0xbe   :  { %v265_v31 = vperm.slane %v249_v29, 0 }
  0xc0   :  { %v297_v32 = vadd.f32 %v265_v31, %v231_v51 }
  0xc4   :  { %1703 = vmatmul.msk.f32.gmra.mxu2 %vm181_vm0, %v301_v33  ;;  %v313_v33 = vmax.f32 %v297_v32, 0.0 }
  0xcc   :  { %1704 = vmatmul.msk.f32.gmra.mxu2 %vm181_vm0, %v302_v37 }
  0xd4   :  { %1705 = vmatmul.msk.f32.gmra.mxu2 %vm181_vm0, %v303_v41 }
  0xdc   :  { %1706 = vmatmul.msk.f32.gmra.mxu2 %vm181_vm0, %v304_v45 }
  0xe4   :  { %1707 = vmatmul.msk.f32.gmra.mxu2 %vm181_vm0, %v305_v52 }
  0xec   :  { %1708 = vmatmul.msk.f32.gmra.mxu2 %vm181_vm0, %v306_v55 }
  0xf4   :  { %1709 = vmatmul.msk.f32.gmra.mxu2 %vm181_vm0, %v307_v59 }
  0xfc   :  { %1710 = vmatmul.msk.f32.gmra.mxu2 %vm181_vm0, %v308_v63 }
 0x104   :  { %1711 = vmatmul.msk.f32.gmra.mxu2 %vm181_vm0, %v309_v18 }
 0x10c   :  { %1712 = vmatmul.msk.f32.gmra.mxu2 %vm181_vm0, %v310_v22 }
 0x114   :  { %1713 = vmatmul.msk.f32.gmra.mxu2 %vm181_vm0, %v311_v26 }
 0x11c   :  { %1714 = vmatmul.msk.f32.gmra.mxu2 %vm181_vm0, %v312_v30 }
 0x124   :  { %1715 = vmatmul.msk.f32.gmra.mxu2 %vm181_vm0, %v313_v33 }
 0x12f   :  { %v379_v34 = vpop.f32.mrf.mxu2 }
 0x130   :  { %v380_v30 = vadd.f32 %v2232_v49, %v379_v34 }
 0x132   :  { %v427_v33 = vmax.f32 %v380_v30, 0.0 }
 0x137   :  { %v382_v35 = vpop.f32.mrf.mxu2 }
 0x138   :  { %v383_v28 = vadd.f32 %v2232_v49, %v382_v35  ;;  %v2255_v35 = vld [vmem:[#allocation5 + $0x8] sm:$0xff] }
 0x13a   :  { %v428_v32 = vmax.f32 %v383_v28, 0.0 }
 0x13f   :  { %v385_v36 = vpop.f32.mrf.mxu2 }
 0x140   :  { %v386_v26 = vadd.f32 %v2232_v49, %v385_v36 }
 0x142   :  { %v429_v31 = vmax.f32 %v386_v26, 0.0 }
 0x147   :  { %v388_v37 = vpop.f32.mrf.mxu2 }
 0x148   :  { %v389_v24 = vadd.f32 %v2232_v49, %v388_v37 }
 0x14a   :  { %v430_v29 = vmax.f32 %v389_v24, 0.0 }
 0x14f   :  { %v391_v38 = vpop.f32.mrf.mxu2 }
 0x150   :  { %v392_v22 = vadd.f32 %v2232_v49, %v391_v38  ;;  %v2250_v38 = vld [vmem:[#allocation5] sm:$0xff] }
 0x152   :  { %v431_v27 = vmax.f32 %v392_v22, 0.0 }
 0x157   :  { %v394_v39 = vpop.f32.mrf.mxu2 }
 0x158   :  { %v395_v20 = vadd.f32 %v2232_v49, %v394_v39 }
 0x15a   :  { %v432_v25 = vmax.f32 %v395_v20, 0.0 }
 0x15f   :  { %v397_v40 = vpop.f32.mrf.mxu2 }
 0x160   :  { %v398_v18 = vadd.f32 %v2232_v49, %v397_v40 }
 0x162   :  { %v433_v23 = vmax.f32 %v398_v18, 0.0 }
 0x167   :  { %v400_v41 = vpop.f32.mrf.mxu2 }
 0x168   :  { %v401_v16 = vadd.f32 %v2232_v49, %v400_v41 }
 0x16a   :  { %v434_v21 = vmax.f32 %v401_v16, 0.0 }
 0x16f   :  { %v403_v42 = vpop.f32.mrf.mxu2 }
 0x170   :  { %v404_v63 = vadd.f32 %v2232_v49, %v403_v42 }
 0x172   :  { %v435_v19 = vmax.f32 %v404_v63, 0.0 }
 0x177   :  { %v406_v43 = vpop.f32.mrf.mxu2 }
 0x178   :  { %v407_v61 = vadd.f32 %v2232_v49, %v406_v43 }
 0x17a   :  { %v436_v17 = vmax.f32 %v407_v61, 0.0 }
 0x17f   :  { %v409_v44 = vpop.f32.mrf.mxu2 }
 0x180   :  { %v410_v59 = vadd.f32 %v2232_v49, %v409_v44 }
 0x182   :  { %v437_v15 = vmax.f32 %v410_v59, 0.0 }
 0x187   :  { %v412_v45 = vpop.f32.mrf.mxu2 }
 0x188   :  { %v413_v57 = vadd.f32 %v2232_v49, %v412_v45 }
 0x18a   :  { %v438_v62 = vmax.f32 %v413_v57, 0.0 }
 0x18f   :  { %v415_v46 = vpop.f32.mrf.mxu2 }
 0x190   :  { %v416_v55 = vadd.f32 %v2232_v49, %v415_v46 }
 0x192   :  { %v439_v60 = vmax.f32 %v416_v55, 0.0 }
 0x197   :  { %v418_v47 = vpop.f32.mrf.mxu2 }
 0x198   :  { %v419_v53 = vadd.f32 %v2232_v49, %v418_v47 }
 0x19a   :  { %v440_v58 = vmax.f32 %v419_v53, 0.0 }
 0x19f   :  { %v421_v48 = vpop.f32.mrf.mxu2 }
 0x1a0   :  { %v422_v51 = vadd.f32 %v2232_v49, %v421_v48 }
 0x1a2   :  { %v441_v56 = vmax.f32 %v422_v51, 0.0 }
 0x1a7   :  { %v424_v50 = vpop.f32.mrf.mxu2 }
 0x1a8   :  { %v425_v52 = vadd.f32 %v2232_v49, %v424_v50 }
 0x1aa   :  { %v442_v54 = vmax.f32 %v425_v52, 0.0 }
 0x1ac   :  { %443 = vmatpush.msra.mxu3 %v442_v54 }
 0x1ae   :  { %444 = vmatpush.msra.mxu3 %v441_v56 }
 0x1b0   :  { %445 = vmatpush.msra.mxu3 %v440_v58 }
 0x1b2   :  { %446 = vmatpush.msra.mxu3 %v439_v60 }
 0x1b4   :  { %447 = vmatpush.msra.mxu3 %v438_v62 }
 0x1b6   :  { %448 = vmatpush.msra.mxu3 %v437_v15 }
 0x1b8   :  { %449 = vmatpush.msra.mxu3 %v436_v17 }
 0x1ba   :  { %450 = vmatpush.msra.mxu3 %v435_v19 }
 0x1bc   :  { %451 = vmatpush.msra.mxu3 %v434_v21 }
 0x1be   :  { %452 = vmatpush.msra.mxu3 %v433_v23 }
 0x1c0   :  { %453 = vmatpush.msra.mxu3 %v432_v25 }
 0x1c2   :  { %454 = vmatpush.msra.mxu3 %v431_v27 }
 0x1c4   :  { %455 = vmatpush.msra.mxu3 %v430_v29 }
 0x1c6   :  { %456 = vmatpush.msra.mxu3 %v429_v31 }
 0x1c8   :  { %457 = vmatpush.msra.mxu3 %v428_v32 }
 0x1ca   :  { %458 = vmatpush.msra.mxu3 %v427_v33 }
 0x1cb   :  { %459 = vmatmul.f32.vlgmr.msra.gmra.mxu3 %v2250_v38 }
 0x1cc   :  { %772 = vmatpush.msrb.mxu3 %v2138_v0 }
 0x1ce   :  { %773 = vmatpush.msrb.mxu3 %v2141_v1 }
 0x1d0   :  { %774 = vmatpush.msrb.mxu3 %v2145_v3 }
 0x1d2   :  { %775 = vmatpush.msrb.mxu3 %v2153_v6 }
 0x1d3   :  { %462 = vmatmul.f32.gmra.mxu3 %v2255_v35 }
 0x1d4   :  { %795 = vmatpush.msra.mxu3 %v2143_v2 }
 0x1d6   :  { %796 = vmatpush.msra.mxu3 %v2148_v4 }
 0x1d8   :  { %797 = vmatpush.msra.mxu3 %v2151_v5 }
 0x1da   :  { %798 = vmatpush.msra.mxu3 %v2159_v8 }
 0x24e   :  { %v460_v34 = vpop.f32.mrf.mxu3 }
 0x24f   :  { %v2265_v36 = vadd.f32 %v460_v34, %v2157_v7 }
 0x251   :  { %1716 = vmatmul.msk.f32.vlgmr.msrb.gmra.mxu0 %vm181_vm0, %v2265_v36  ;;  %1718 = vmatmul.msk.f32.vlgmr.msrb.gmra.mxu1 %vm181_vm0, %v2265_v36 }
 0x252   :  { %1344 = vmatpush.msrb.mxu0 %v2138_v0 }
 0x254   :  { %1345 = vmatpush.msrb.mxu0 %v2141_v1 }
 0x256   :  { %v463_v2 = vpop.f32.mrf.mxu3  ;;  %1346 = vmatpush.msrb.mxu0 %v2145_v3 }
 0x257   :  { %v2275_v4 = vadd.f32 %v463_v2, %v2172_v9 }
 0x258   :  { %1347 = vmatpush.msrb.mxu0 %v2153_v6 }
 0x259   :  { %1717 = vmatmul.msk.f32.gmra.mxu0 %vm181_vm0, %v2275_v4  ;;  %1719 = vmatmul.msk.f32.gmra.mxu1 %vm181_vm0, %v2275_v4 }
 0x2ce   :  { %v491_v5 = vpop.f32.mrf.mxu0  ;;  %v2287_v3 = vpop.f32.mrf.mxu1 }
 0x2cf   :  { %v2283_v7 = vadd.f32 %v2209_v14, %v491_v5 }
 0x2d1   :  { %v536_v0 = vperm.slane %v2283_v7, 0  ;;  %v522_v1 = vrot.slane %v2283_v7, 1  ;;  %v523_v42 = vrot.slane %v2283_v7, 2  ;;  %v524_v53 = vrot.slane %v2283_v7, 3 }
 0x2d2   :  { %v525_v61 = vrot.slane %v2283_v7, 4  ;;  %v526_v20 = vrot.slane %v2283_v7, 5  ;;  %v527_v28 = vrot.slane %v2283_v7, 6  ;;  %v528_v5 = vrot.slane %v2283_v7, 7 }
 0x2d3   :  { %v568_v8 = vadd.f32 %v536_v0, %v2287_v3  ;;  %v537_v6 = vperm.slane %v522_v1, 0  ;;  %v538_v48 = vperm.slane %v523_v42, 0  ;;  %v539_v57 = vperm.slane %v524_v53, 0 }
 0x2d4   :  { %v540_v16 = vperm.slane %v525_v61, 0  ;;  %v541_v24 = vperm.slane %v526_v20, 0  ;;  %v542_v32 = vperm.slane %v527_v28, 0 }
 0x2d5   :  { %v584_v9 = vmax.f32 %v568_v8, 0.0  ;;  %v569_v40 = vadd.f32 %v537_v6, %v2287_v3  ;;  %v570_v52 = vadd.f32 %v538_v48, %v2287_v3  ;;  %v571_v60 = vadd.f32 %v539_v57, %v2287_v3 }
 0x2d6   :  { %v494_v37 = vpop.f32.mrf.mxu0  ;;  %v2300_v45 = vpop.f32.mrf.mxu1  ;;  %v572_v19 = vadd.f32 %v540_v16, %v2287_v3  ;;  %v573_v27 = vadd.f32 %v541_v24, %v2287_v3  ;;  %v574_v2 = vadd.f32 %v542_v32, %v2287_v3 }
 0x2d7   :  { %v2291_v39 = vadd.f32 %v2209_v14, %v494_v37  ;;  %1720 = vmatmul.msk.f32.vlgmr.msra.gmra.mxu0 %vm181_vm0, %v584_v9  ;;  %v585_v46 = vmax.f32 %v569_v40, 0.0  ;;  %v586_v56 = vmax.f32 %v570_v52, 0.0  ;;  %v587_v15 = vmax.f32 %v571_v60, 0.0 }
 0x2d8   :  { %1518 = vmatpush.msra.mxu0 %v2182_v10  ;;  %v588_v23 = vmax.f32 %v572_v19, 0.0  ;;  %v589_v31 = vmax.f32 %v573_v27, 0.0  ;;  %v590_v8 = vmax.f32 %v574_v2, 0.0  ;;  %v543_v9 = vperm.slane %v528_v5, 0 }
 0x2d9   :  { %v529_v41 = vrot.slane %v2291_v39, 1  ;;  %v530_v44 = vrot.slane %v2291_v39, 2  ;;  %v531_v55 = vrot.slane %v2291_v39, 3  ;;  %v532_v63 = vrot.slane %v2291_v39, 4 }
 0x2da   :  { %1519 = vmatpush.msra.mxu0 %v2184_v11  ;;  %v533_v22 = vrot.slane %v2291_v39, 5  ;;  %v534_v30 = vrot.slane %v2291_v39, 6  ;;  %v535_v1 = vrot.slane %v2291_v39, 7  ;;  %v575_v40 = vadd.f32 %v543_v9, %v2287_v3 }
 0x2db   :  { %v545_v43 = vperm.slane %v529_v41, 0  ;;  %v546_v51 = vperm.slane %v530_v44, 0  ;;  %v547_v59 = vperm.slane %v531_v55, 0  ;;  %v548_v18 = vperm.slane %v532_v63, 0 }
 0x2dc   :  { %1520 = vmatpush.msra.mxu0 %v2188_v12  ;;  %v549_v26 = vperm.slane %v533_v22, 0  ;;  %v550_v34 = vperm.slane %v534_v30, 0  ;;  %v551_v37 = vperm.slane %v535_v1, 0  ;;  %v591_v42 = vmax.f32 %v575_v40, 0.0 }
 0x2dd   :  { %v577_v47 = vadd.f32 %v545_v43, %v2300_v45  ;;  %v578_v54 = vadd.f32 %v546_v51, %v2300_v45  ;;  %v579_v62 = vadd.f32 %v547_v59, %v2300_v45  ;;  %v580_v21 = vadd.f32 %v548_v18, %v2300_v45 }
 0x2de   :  { %1521 = vmatpush.msra.mxu0 %v2193_v13  ;;  %v581_v29 = vadd.f32 %v549_v26, %v2300_v45  ;;  %v582_v0 = vadd.f32 %v550_v34, %v2300_v45  ;;  %v583_v41 = vadd.f32 %v551_v37, %v2300_v45  ;;  %v544_v43 = vperm.slane %v2291_v39, 0 }
 0x2df   :  { %1721 = vmatmul.msk.f32.gmra.mxu0 %vm181_vm0, %v585_v46  ;;  %v593_v50 = vmax.f32 %v577_v47, 0.0  ;;  %v594_v58 = vmax.f32 %v578_v54, 0.0  ;;  %v595_v17 = vmax.f32 %v579_v62, 0.0  ;;  %v596_v25 = vmax.f32 %v580_v21, 0.0 }
 0x2e0   :  { %v597_v33 = vmax.f32 %v581_v29, 0.0  ;;  %v598_v6 = vmax.f32 %v582_v0, 0.0  ;;  %v599_v7 = vmax.f32 %v583_v41, 0.0  ;;  %v576_v44 = vadd.f32 %v544_v43, %v2300_v45 }
 0x2e1   :  { %1729 = vmatmul.msk.f32.vlgmr.msra.gmra.mxu1 %vm181_vm0, %v593_v50 }
 0x2e2   :  { %v592_v46 = vmax.f32 %v576_v44, 0.0 }
 0x2e7   :  { %1722 = vmatmul.msk.f32.gmra.mxu0 %vm181_vm0, %v586_v56 }
 0x2e9   :  { %1730 = vmatmul.msk.f32.gmra.mxu1 %vm181_vm0, %v594_v58 }
 0x2ef   :  { %1723 = vmatmul.msk.f32.gmra.mxu0 %vm181_vm0, %v587_v15 }
 0x2f1   :  { %1731 = vmatmul.msk.f32.gmra.mxu1 %vm181_vm0, %v595_v17 }
 0x2f7   :  { %1724 = vmatmul.msk.f32.gmra.mxu0 %vm181_vm0, %v588_v23 }
 0x2f9   :  { %1732 = vmatmul.msk.f32.gmra.mxu1 %vm181_vm0, %v596_v25 }
 0x2ff   :  { %1725 = vmatmul.msk.f32.gmra.mxu0 %vm181_vm0, %v589_v31 }
 0x301   :  { %1733 = vmatmul.msk.f32.gmra.mxu1 %vm181_vm0, %v597_v33 }
 0x307   :  { %1726 = vmatmul.msk.f32.gmra.mxu0 %vm181_vm0, %v590_v8 }
 0x309   :  { %1734 = vmatmul.msk.f32.gmra.mxu1 %vm181_vm0, %v598_v6 }
 0x30f   :  { %1727 = vmatmul.msk.f32.gmra.mxu0 %vm181_vm0, %v591_v42 }
 0x311   :  { %1735 = vmatmul.msk.f32.gmra.mxu1 %vm181_vm0, %v599_v7 }
 0x317   :  { %1728 = vmatmul.msk.f32.gmra.mxu0 %vm181_vm0, %v592_v46 }
 0x354   :  { %v665_v47 = vpop.f32.mrf.mxu0 }
 0x355   :  { %v666_v9 = vadd.f32 %v2232_v49, %v665_v47 }
 0x357   :  { %v713_v40 = vmax.f32 %v666_v9, 0.0 }
 0x35c   :  { %v668_v48 = vpop.f32.mrf.mxu0 }
 0x35d   :  { %v669_v1 = vadd.f32 %v2232_v49, %v668_v48 }
 0x35e   :  { %v692_v50 = vpop.f32.mrf.mxu1 }
 0x35f   :  { %v693_v22 = vadd.f32 %v2232_v49, %v692_v50  ;;  %v714_v37 = vmax.f32 %v669_v1, 0.0 }
 0x361   :  { %v722_v26 = vmax.f32 %v693_v22, 0.0 }
 0x364   :  { %v671_v51 = vpop.f32.mrf.mxu0 }
 0x365   :  { %v672_v5 = vadd.f32 %v2232_v49, %v671_v51 }
 0x366   :  { %v695_v3 = vpop.f32.mrf.mxu1 }
 0x367   :  { %v696_v19 = vadd.f32 %v2232_v49, %v695_v3  ;;  %v715_v6 = vmax.f32 %v672_v5, 0.0 }
 0x369   :  { %v723_v24 = vmax.f32 %v696_v19, 0.0 }
 0x36c   :  { %v674_v52 = vpop.f32.mrf.mxu0 }
 0x36d   :  { %v675_v34 = vadd.f32 %v2232_v49, %v674_v52 }
 0x36e   :  { %v698_v53 = vpop.f32.mrf.mxu1 }
 0x36f   :  { %v699_v17 = vadd.f32 %v2232_v49, %v698_v53  ;;  %v716_v8 = vmax.f32 %v675_v34, 0.0 }
 0x371   :  { %v724_v23 = vmax.f32 %v699_v17, 0.0 }
 0x374   :  { %v677_v54 = vpop.f32.mrf.mxu0 }
 0x375   :  { %v678_v32 = vadd.f32 %v2232_v49, %v677_v54 }
 0x376   :  { %v701_v55 = vpop.f32.mrf.mxu1 }
 0x377   :  { %v702_v15 = vadd.f32 %v2232_v49, %v701_v55  ;;  %v717_v0 = vmax.f32 %v678_v32, 0.0 }
 0x379   :  { %v725_v20 = vmax.f32 %v702_v15, 0.0 }
 0x37c   :  { %v680_v39 = vpop.f32.mrf.mxu0 }
 0x37d   :  { %v681_v30 = vadd.f32 %v2232_v49, %v680_v39 }
 0x37e   :  { %v704_v56 = vpop.f32.mrf.mxu1 }
 0x37f   :  { %v705_v62 = vadd.f32 %v2232_v49, %v704_v56  ;;  %v718_v2 = vmax.f32 %v681_v30, 0.0 }
 0x381   :  { %v726_v18 = vmax.f32 %v705_v62, 0.0 }
 0x384   :  { %v683_v57 = vpop.f32.mrf.mxu0 }
 0x385   :  { %v684_v28 = vadd.f32 %v2232_v49, %v683_v57 }
 0x386   :  { %v707_v58 = vpop.f32.mrf.mxu1 }
 0x387   :  { %v708_v45 = vadd.f32 %v2232_v49, %v707_v58  ;;  %v719_v33 = vmax.f32 %v684_v28, 0.0 }
 0x389   :  { %v727_v16 = vmax.f32 %v708_v45, 0.0 }
 0x38c   :  { %v686_v59 = vpop.f32.mrf.mxu0 }
 0x38d   :  { %v687_v27 = vadd.f32 %v2232_v49, %v686_v59 }
 0x38e   :  { %v710_v60 = vpop.f32.mrf.mxu1 }
 0x38f   :  { %v711_v61 = vadd.f32 %v2232_v49, %v710_v60  ;;  %v720_v31 = vmax.f32 %v687_v27, 0.0 }
 0x391   :  { %v728_v63 = vmax.f32 %v711_v61, 0.0 }
 0x393   :  { %729 = vmatpush.msrb.mxu1 %v728_v63 }
 0x394   :  { %v689_v21 = vpop.f32.mrf.mxu0 }
 0x395   :  { %730 = vmatpush.msrb.mxu1 %v727_v16  ;;  %v690_v25 = vadd.f32 %v2232_v49, %v689_v21 }
 0x397   :  { %731 = vmatpush.msrb.mxu1 %v726_v18  ;;  %v721_v29 = vmax.f32 %v690_v25, 0.0 }
 0x399   :  { %732 = vmatpush.msrb.mxu1 %v725_v20 }
 0x39b   :  { %733 = vmatpush.msrb.mxu1 %v724_v23 }
 0x39d   :  { %734 = vmatpush.msrb.mxu1 %v723_v24 }
 0x39f   :  { %735 = vmatpush.msrb.mxu1 %v722_v26 }
 0x3a1   :  { %736 = vmatpush.msrb.mxu1 %v721_v29 }
 0x3a3   :  { %737 = vmatpush.msrb.mxu1 %v720_v31 }
 0x3a5   :  { %738 = vmatpush.msrb.mxu1 %v719_v33 }
 0x3a7   :  { %739 = vmatpush.msrb.mxu1 %v718_v2 }
 0x3a9   :  { %740 = vmatpush.msrb.mxu1 %v717_v0 }
 0x3ab   :  { %741 = vmatpush.msrb.mxu1 %v716_v8 }
 0x3ad   :  { %742 = vmatpush.msrb.mxu1 %v715_v6 }
 0x3af   :  { %743 = vmatpush.msrb.mxu1 %v714_v37 }
 0x3b1   :  { %744 = vmatpush.msrb.mxu1 %v713_v40 }
 0x3b2   :  { %745 = vmatmul.f32.vlgmr.msrb.gmra.mxu1 %v2250_v38 }
 0x3b3   :  { %946 = vmatpush.msra.mxu1 %v2182_v10 }
 0x3b5   :  { %947 = vmatpush.msra.mxu1 %v2184_v11 }
 0x3b7   :  { %948 = vmatpush.msra.mxu1 %v2188_v12 }
 0x3b9   :  { %949 = vmatpush.msra.mxu1 %v2193_v13 }
 0x3ba   :  { %748 = vmatmul.f32.gmra.mxu1 %v2255_v35 }
 0x42f   :  { %v746_v41 = vpop.f32.mrf.mxu1 }
 0x430   :  { %v2367_v42 = vadd.f32 %v746_v41, %v2265_v36 }
 0x432   :  { %1736 = vmatmul.msk.f32.vlgmr.msrb.gmra.mxu3 %vm181_vm0, %v2367_v42 }
 0x437   :  { %v749_v43 = vpop.f32.mrf.mxu1 }
 0x438   :  { %v2372_v7 = vadd.f32 %v749_v43, %v2275_v4 }
 0x43a   :  { %1737 = vmatmul.msk.f32.gmra.mxu3 %vm181_vm0, %v2372_v7 }
 0x442   :  { %1738 = vmatmul.msk.f32.vlgmr.msra.gmra.mxu3 %vm181_vm0, %v2367_v42 }
 0x44a   :  { %1739 = vmatmul.msk.f32.gmra.mxu3 %vm181_vm0, %v2372_v7 }
 0x4b5   :  { %v777_v10 = vpop.f32.mrf.mxu3 }
 0x4b6   :  { %v778_v12 = vadd.f32 %v2209_v14, %v777_v10 }
 0x4b8   :  { %v822_v13 = vperm.slane %v778_v12, 0  ;;  %v808_v46 = vrot.slane %v778_v12, 1  ;;  %v809_v50 = vrot.slane %v778_v12, 2  ;;  %v810_v53 = vrot.slane %v778_v12, 3 }
 0x4b9   :  { %v811_v56 = vrot.slane %v778_v12, 4  ;;  %v812_v60 = vrot.slane %v778_v12, 5  ;;  %v813_v63 = vrot.slane %v778_v12, 6  ;;  %v814_v18 = vrot.slane %v778_v12, 7 }
 0x4ba   :  { %v823_v4 = vperm.slane %v808_v46, 0  ;;  %v824_v3 = vperm.slane %v809_v50, 0  ;;  %v825_v55 = vperm.slane %v810_v53, 0 }
 0x4bb   :  { %v826_v58 = vperm.slane %v811_v56, 0  ;;  %v827_v61 = vperm.slane %v812_v60, 0  ;;  %v828_v16 = vperm.slane %v813_v63, 0  ;;  %v829_v20 = vperm.slane %v814_v18, 0 }
 0x4bd   :  { %v780_v11 = vpop.f32.mrf.mxu3 }
 0x4be   :  { %v781_v22 = vadd.f32 %v2209_v14, %v780_v11 }
 0x4c0   :  { %v830_v25 = vperm.slane %v781_v22, 0  ;;  %v815_v27 = vrot.slane %v781_v22, 1  ;;  %v816_v31 = vrot.slane %v781_v22, 2  ;;  %v817_v2 = vrot.slane %v781_v22, 3 }
 0x4c1   :  { %v818_v8 = vrot.slane %v781_v22, 4  ;;  %v819_v40 = vrot.slane %v781_v22, 5  ;;  %v820_v11 = vrot.slane %v781_v22, 6 }
 0x4c2   :  { %v831_v29 = vperm.slane %v815_v27, 0  ;;  %v832_v33 = vperm.slane %v816_v31, 0  ;;  %v833_v0 = vperm.slane %v817_v2, 0 }
 0x4c3   :  { %v834_v6 = vperm.slane %v818_v8, 0  ;;  %v835_v43 = vperm.slane %v819_v40, 0 }
 0x4c5   :  { %v800_v36 = vpop.f32.mrf.mxu3 }
 0x4c6   :  { %v854_v44 = vadd.f32 %v822_v13, %v800_v36  ;;  %v855_v48 = vadd.f32 %v823_v4, %v800_v36  ;;  %v856_v52 = vadd.f32 %v824_v3, %v800_v36  ;;  %v857_v39 = vadd.f32 %v825_v55, %v800_v36 }
 0x4c7   :  { %v858_v59 = vadd.f32 %v826_v58, %v800_v36  ;;  %v859_v62 = vadd.f32 %v827_v61, %v800_v36  ;;  %v860_v17 = vadd.f32 %v828_v16, %v800_v36  ;;  %v861_v21 = vadd.f32 %v829_v20, %v800_v36 }
 0x4c8   :  { %v870_v47 = vmax.f32 %v854_v44, 0.0  ;;  %v871_v51 = vmax.f32 %v855_v48, 0.0  ;;  %v872_v54 = vmax.f32 %v856_v52, 0.0  ;;  %v873_v57 = vmax.f32 %v857_v39, 0.0 }
 0x4c9   :  { %v874_v45 = vmax.f32 %v858_v59, 0.0  ;;  %v875_v15 = vmax.f32 %v859_v62, 0.0  ;;  %v876_v19 = vmax.f32 %v860_v17, 0.0  ;;  %v877_v23 = vmax.f32 %v861_v21, 0.0 }
 0x4ca   :  { %1740 = vmatmul.msk.f32.vlgmr.msra.gmra.mxu1 %vm181_vm0, %v870_v47  ;;  %v836_v13 = vperm.slane %v820_v11, 0  ;;  %v821_v44 = vrot.slane %v781_v22, 7  ;;  %v1818_v11 = vld [vmem:[#allocation7 + $0x10] sm:$0xff] }
 0x4cc   :  { %v837_v47 = vperm.slane %v821_v44, 0  ;;  %v2419_v44 = vld [vmem:[#allocation8 + $0x10] sm:$0xff] }
 0x4cd   :  { %v803_v24 = vpop.f32.mrf.mxu3 }
 0x4ce   :  { %v862_v26 = vadd.f32 %v830_v25, %v803_v24  ;;  %v863_v30 = vadd.f32 %v831_v29, %v803_v24  ;;  %v864_v34 = vadd.f32 %v832_v33, %v803_v24  ;;  %v865_v1 = vadd.f32 %v833_v0, %v803_v24 }
 0x4cf   :  { %v866_v37 = vadd.f32 %v834_v6, %v803_v24  ;;  %v867_v10 = vadd.f32 %v835_v43, %v803_v24  ;;  %v868_v36 = vadd.f32 %v836_v13, %v803_v24  ;;  %v869_v4 = vadd.f32 %v837_v47, %v803_v24  ;;  %v1820_v13 = vld [vmem:[#allocation7] sm:$0xff] }
 0x4d0   :  { %v878_v28 = vmax.f32 %v862_v26, 0.0  ;;  %v879_v32 = vmax.f32 %v863_v30, 0.0  ;;  %v880_v5 = vmax.f32 %v864_v34, 0.0  ;;  %v881_v9 = vmax.f32 %v865_v1, 0.0  ;;  %v2425_v47 = vld [vmem:[#allocation8] sm:$0xff] }
 0x4d1   :  { %v882_v41 = vmax.f32 %v866_v37, 0.0  ;;  %v883_v12 = vmax.f32 %v867_v10, 0.0  ;;  %v884_v46 = vmax.f32 %v868_v36, 0.0  ;;  %v885_v48 = vmax.f32 %v869_v4, 0.0  ;;  %v1817_v10 = vld [vmem:[#allocation7 + $0x18] sm:$0xff] }
 0x4d2   :  { %1741 = vmatmul.msk.f32.gmra.mxu1 %vm181_vm0, %v871_v51  ;;  %v2416_v36 = vld [vmem:[#allocation8 + $0x18] sm:$0xff] }
 0x4da   :  { %1742 = vmatmul.msk.f32.gmra.mxu1 %vm181_vm0, %v872_v54 }
 0x4e2   :  { %1743 = vmatmul.msk.f32.gmra.mxu1 %vm181_vm0, %v873_v57 }
 0x4ea   :  { %1744 = vmatmul.msk.f32.gmra.mxu1 %vm181_vm0, %v874_v45 }
 0x4f2   :  { %1745 = vmatmul.msk.f32.gmra.mxu1 %vm181_vm0, %v875_v15 }
 0x4fa   :  { %1746 = vmatmul.msk.f32.gmra.mxu1 %vm181_vm0, %v876_v19 }
 0x502   :  { %1747 = vmatmul.msk.f32.gmra.mxu1 %vm181_vm0, %v877_v23 }
 0x50a   :  { %1748 = vmatmul.msk.f32.gmra.mxu1 %vm181_vm0, %v878_v28 }
 0x512   :  { %1749 = vmatmul.msk.f32.gmra.mxu1 %vm181_vm0, %v879_v32 }
 0x51a   :  { %1750 = vmatmul.msk.f32.gmra.mxu1 %vm181_vm0, %v880_v5 }
 0x522   :  { %1751 = vmatmul.msk.f32.gmra.mxu1 %vm181_vm0, %v881_v9 }
 0x52a   :  { %1752 = vmatmul.msk.f32.gmra.mxu1 %vm181_vm0, %v882_v41 }
 0x532   :  { %1753 = vmatmul.msk.f32.gmra.mxu1 %vm181_vm0, %v883_v12  ;;  %v1819_v12 = vld [vmem:[#allocation7 + $0x8] sm:$0xff] }
 0x53a   :  { %1754 = vmatmul.msk.f32.gmra.mxu1 %vm181_vm0, %v884_v46  ;;  %v2422_v46 = vld [vmem:[#allocation8 + $0x8] sm:$0xff] }
 0x542   :  { %1755 = vmatmul.msk.f32.gmra.mxu1 %vm181_vm0, %v885_v48 }
 0x547   :  { %v951_v50 = vpop.f32.mrf.mxu1 }
 0x548   :  { %v952_v37 = vadd.f32 %v2232_v49, %v951_v50 }
 0x54a   :  { %v999_v43 = vmax.f32 %v952_v37, 0.0 }
 0x54f   :  { %v954_v51 = vpop.f32.mrf.mxu1 }
 0x550   :  { %v955_v9 = vadd.f32 %v2232_v49, %v954_v51 }
 0x552   :  { %v1000_v41 = vmax.f32 %v955_v9, 0.0 }
 0x557   :  { %v957_v3 = vpop.f32.mrf.mxu1 }
 0x558   :  { %v958_v1 = vadd.f32 %v2232_v49, %v957_v3 }
 0x55a   :  { %v1001_v40 = vmax.f32 %v958_v1, 0.0 }
 0x55f   :  { %v960_v52 = vpop.f32.mrf.mxu1 }
 0x560   :  { %v961_v5 = vadd.f32 %v2232_v49, %v960_v52 }
 0x562   :  { %v1002_v6 = vmax.f32 %v961_v5, 0.0 }
 0x567   :  { %v963_v53 = vpop.f32.mrf.mxu1 }
 0x568   :  { %v964_v34 = vadd.f32 %v2232_v49, %v963_v53 }
 0x56a   :  { %v1003_v8 = vmax.f32 %v964_v34, 0.0 }
 0x56f   :  { %v966_v54 = vpop.f32.mrf.mxu1 }
 0x570   :  { %v967_v32 = vadd.f32 %v2232_v49, %v966_v54 }
 0x572   :  { %v1004_v0 = vmax.f32 %v967_v32, 0.0 }
 0x577   :  { %v969_v55 = vpop.f32.mrf.mxu1 }
 0x578   :  { %v970_v30 = vadd.f32 %v2232_v49, %v969_v55 }
 0x57a   :  { %v1005_v2 = vmax.f32 %v970_v30, 0.0 }
 0x57f   :  { %v972_v39 = vpop.f32.mrf.mxu1 }
 0x580   :  { %v973_v28 = vadd.f32 %v2232_v49, %v972_v39 }
 0x582   :  { %v1006_v33 = vmax.f32 %v973_v28, 0.0 }
 0x587   :  { %v975_v56 = vpop.f32.mrf.mxu1 }
 0x588   :  { %v976_v26 = vadd.f32 %v2232_v49, %v975_v56 }
 0x58a   :  { %v1007_v31 = vmax.f32 %v976_v26, 0.0 }
 0x58f   :  { %v978_v57 = vpop.f32.mrf.mxu1 }
 0x590   :  { %v979_v24 = vadd.f32 %v2232_v49, %v978_v57 }
 0x592   :  { %v1008_v29 = vmax.f32 %v979_v24, 0.0 }
 0x597   :  { %v981_v58 = vpop.f32.mrf.mxu1 }
 0x598   :  { %v982_v22 = vadd.f32 %v2232_v49, %v981_v58 }
 0x59a   :  { %v1009_v27 = vmax.f32 %v982_v22, 0.0 }
 0x59f   :  { %v984_v59 = vpop.f32.mrf.mxu1 }
 0x5a0   :  { %v985_v20 = vadd.f32 %v2232_v49, %v984_v59 }
 0x5a2   :  { %v1010_v25 = vmax.f32 %v985_v20, 0.0 }
 0x5a7   :  { %v987_v60 = vpop.f32.mrf.mxu1 }
 0x5a8   :  { %v988_v18 = vadd.f32 %v2232_v49, %v987_v60 }
 0x5aa   :  { %v1011_v23 = vmax.f32 %v988_v18, 0.0 }
 0x5af   :  { %v990_v45 = vpop.f32.mrf.mxu1 }
 0x5b0   :  { %v991_v16 = vadd.f32 %v2232_v49, %v990_v45 }
 0x5b2   :  { %v1012_v21 = vmax.f32 %v991_v16, 0.0 }
 0x5b7   :  { %v993_v61 = vpop.f32.mrf.mxu1 }
 0x5b8   :  { %v994_v63 = vadd.f32 %v2232_v49, %v993_v61 }
 0x5ba   :  { %v1013_v19 = vmax.f32 %v994_v63, 0.0 }
 0x5bf   :  { %v996_v62 = vpop.f32.mrf.mxu1 }
 0x5c0   :  { %v997_v15 = vadd.f32 %v2232_v49, %v996_v62 }
 0x5c2   :  { %v1014_v17 = vmax.f32 %v997_v15, 0.0 }
 0x5c4   :  { %1015 = vmatpush.msrb.mxu3 %v1014_v17 }
 0x5c6   :  { %1016 = vmatpush.msrb.mxu3 %v1013_v19 }
 0x5c8   :  { %1017 = vmatpush.msrb.mxu3 %v1012_v21 }
 0x5ca   :  { %1018 = vmatpush.msrb.mxu3 %v1011_v23 }
 0x5cc   :  { %1019 = vmatpush.msrb.mxu3 %v1010_v25 }
 0x5ce   :  { %1020 = vmatpush.msrb.mxu3 %v1009_v27 }
 0x5d0   :  { %1021 = vmatpush.msrb.mxu3 %v1008_v29 }
 0x5d2   :  { %1022 = vmatpush.msrb.mxu3 %v1007_v31  ;;  %v2453_v31 = vld [vmem:[%s2559_s4] ss:$0 sm:$0xff] }
 0x5d4   :  { %1023 = vmatpush.msrb.mxu3 %v1006_v33 }
 0x5d6   :  { %1024 = vmatpush.msrb.mxu3 %v1005_v2 }
 0x5d8   :  { %1025 = vmatpush.msrb.mxu3 %v1004_v0 }
 0x5da   :  { %1026 = vmatpush.msrb.mxu3 %v1003_v8 }
 0x5dc   :  { %1027 = vmatpush.msrb.mxu3 %v1002_v6 }
 0x5de   :  { %1028 = vmatpush.msrb.mxu3 %v1001_v40 }
 0x5e0   :  { %1029 = vmatpush.msrb.mxu3 %v1000_v41 }
 0x5e2   :  { %1030 = vmatpush.msrb.mxu3 %v999_v43 }
 0x5e3   :  { %1031 = vmatmul.f32.vlgmr.msrb.gmra.mxu3 %v2250_v38 }
 0x5e4   :  { %1058 = vmatpush.msra.mxu3 %v1817_v10 }
 0x5e6   :  { %1059 = vmatpush.msra.mxu3 %v1818_v11 }
 0x5e8   :  { %1060 = vmatpush.msra.mxu3 %v1819_v12 }
 0x5ea   :  { %1061 = vmatpush.msra.mxu3 %v1820_v13 }
 0x5eb   :  { %1034 = vmatmul.f32.gmra.mxu3 %v2255_v35 }
 0x5ec   :  { %1081 = vmatpush.msrb.mxu3 %v2416_v36 }
 0x5ee   :  { %1082 = vmatpush.msrb.mxu3 %v2419_v44 }
 0x5f0   :  { %1083 = vmatpush.msrb.mxu3 %v2422_v46 }
 0x5f2   :  { %1084 = vmatpush.msrb.mxu3 %v2425_v47 }
 0x666   :  { %v1032_v4 = vpop.f32.mrf.mxu3 }
 0x667   :  { %v2429_v48 = vadd.f32 %v1032_v4, %v2367_v42 }
 0x669   :  { %1756 = vmatmul.msk.f32.vlgmr.msra.gmra.mxu3 %vm181_vm0, %v2429_v48 }
 0x66e   :  { %v1035_v50 = vpop.f32.mrf.mxu3 }
 0x66f   :  { %v2434_v51 = vadd.f32 %v1035_v50, %v2372_v7 }
 0x671   :  { %1757 = vmatmul.msk.f32.gmra.mxu3 %vm181_vm0, %v2434_v51 }
 0x679   :  { %1758 = vmatmul.msk.f32.vlgmr.msrb.gmra.mxu3 %vm181_vm0, %v2429_v48 }
 0x681   :  { %1759 = vmatmul.msk.f32.gmra.mxu3 %vm181_vm0, %v2434_v51 }
 0x6ec   :  { %v1063_v3 = vpop.f32.mrf.mxu3 }
 0x6ed   :  { %v1064_v42 = vadd.f32 %v2209_v14, %v1063_v3 }
 0x6ef   :  { %v1108_v53 = vperm.slane %v1064_v42, 0  ;;  %v1094_v39 = vrot.slane %v1064_v42, 1  ;;  %v1095_v58 = vrot.slane %v1064_v42, 2  ;;  %v1096_v61 = vrot.slane %v1064_v42, 3 }
 0x6f0   :  { %v1097_v15 = vrot.slane %v1064_v42, 4  ;;  %v1098_v19 = vrot.slane %v1064_v42, 5  ;;  %v1099_v23 = vrot.slane %v1064_v42, 6  ;;  %v1100_v27 = vrot.slane %v1064_v42, 7 }
 0x6f1   :  { %v1109_v7 = vperm.slane %v1094_v39, 0  ;;  %v1110_v60 = vperm.slane %v1095_v58, 0  ;;  %v1111_v14 = vperm.slane %v1096_v61, 0 }
 0x6f2   :  { %v1112_v17 = vperm.slane %v1097_v15, 0  ;;  %v1113_v21 = vperm.slane %v1098_v19, 0  ;;  %v1114_v25 = vperm.slane %v1099_v23, 0  ;;  %v1115_v29 = vperm.slane %v1100_v27, 0 }
 0x6f4   :  { %v1066_v52 = vpop.f32.mrf.mxu3 }
 0x6f5   :  { %v1067_v32 = vadd.f32 %v2453_v31, %v1066_v52 }
 0x6f7   :  { %v1116_v2 = vperm.slane %v1067_v32, 0  ;;  %v1101_v0 = vrot.slane %v1067_v32, 1  ;;  %v1102_v6 = vrot.slane %v1067_v32, 2  ;;  %v1103_v43 = vrot.slane %v1067_v32, 3 }
 0x6f8   :  { %v1104_v13 = vrot.slane %v1067_v32, 4  ;;  %v1105_v52 = vrot.slane %v1067_v32, 5 }
 0x6f9   :  { %v1117_v8 = vperm.slane %v1101_v0, 0  ;;  %v1118_v40 = vperm.slane %v1102_v6, 0  ;;  %v1119_v11 = vperm.slane %v1103_v43, 0 }
 0x6fa   :  { %v1120_v50 = vperm.slane %v1104_v13, 0 }
 0x6fc   :  { %v1086_v54 = vpop.f32.mrf.mxu3 }
 0x6fd   :  { %v1140_v55 = vadd.f32 %v1108_v53, %v1086_v54  ;;  %v1141_v57 = vadd.f32 %v1109_v7, %v1086_v54  ;;  %v1142_v45 = vadd.f32 %v1110_v60, %v1086_v54  ;;  %v1143_v63 = vadd.f32 %v1111_v14, %v1086_v54 }
 0x6fe   :  { %v1144_v18 = vadd.f32 %v1112_v17, %v1086_v54  ;;  %v1145_v22 = vadd.f32 %v1113_v21, %v1086_v54  ;;  %v1146_v26 = vadd.f32 %v1114_v25, %v1086_v54  ;;  %v1147_v30 = vadd.f32 %v1115_v29, %v1086_v54 }
 0x6ff   :  { %v1156_v56 = vmax.f32 %v1140_v55, 0.0  ;;  %v1157_v59 = vmax.f32 %v1141_v57, 0.0  ;;  %v1158_v62 = vmax.f32 %v1142_v45, 0.0  ;;  %v1159_v16 = vmax.f32 %v1143_v63, 0.0 }
 0x700   :  { %v1160_v20 = vmax.f32 %v1144_v18, 0.0  ;;  %v1161_v24 = vmax.f32 %v1145_v22, 0.0  ;;  %v1162_v28 = vmax.f32 %v1146_v26, 0.0  ;;  %v1163_v33 = vmax.f32 %v1147_v30, 0.0 }
 0x701   :  { %1760 = vmatmul.msk.f32.vlgmr.msrb.gmra.mxu2 %vm181_vm0, %v1156_v56  ;;  %v1121_v53 = vperm.slane %v1105_v52, 0  ;;  %v1106_v55 = vrot.slane %v1067_v32, 6  ;;  %v1107_v57 = vrot.slane %v1067_v32, 7 }
 0x703   :  { %v1122_v56 = vperm.slane %v1106_v55, 0 }
 0x704   :  { %v1089_v34 = vpop.f32.mrf.mxu3 }
 0x705   :  { %v1148_v5 = vadd.f32 %v1116_v2, %v1089_v34  ;;  %v1149_v9 = vadd.f32 %v1117_v8, %v1089_v34  ;;  %v1150_v41 = vadd.f32 %v1118_v40, %v1089_v34  ;;  %v1151_v12 = vadd.f32 %v1119_v11, %v1089_v34 }
 0x706   :  { %v1152_v3 = vadd.f32 %v1120_v50, %v1089_v34  ;;  %v1153_v54 = vadd.f32 %v1121_v53, %v1089_v34  ;;  %v1154_v7 = vadd.f32 %v1122_v56, %v1089_v34 }
 0x707   :  { %v1164_v1 = vmax.f32 %v1148_v5, 0.0  ;;  %v1165_v37 = vmax.f32 %v1149_v9, 0.0  ;;  %v1166_v10 = vmax.f32 %v1150_v41, 0.0  ;;  %v1167_v4 = vmax.f32 %v1151_v12, 0.0 }
 0x708   :  { %v1168_v42 = vmax.f32 %v1152_v3, 0.0  ;;  %v1169_v39 = vmax.f32 %v1153_v54, 0.0  ;;  %v1170_v58 = vmax.f32 %v1154_v7, 0.0 }
 0x709   :  { %1761 = vmatmul.msk.f32.gmra.mxu2 %vm181_vm0, %v1157_v59  ;;  %v1123_v59 = vperm.slane %v1107_v57, 0 }
 0x70b   :  { %v1155_v60 = vadd.f32 %v1123_v59, %v1089_v34  ;;  %v2472_v34 = vld [vmem:[%s2561_s6] ss:$0 sm:$0xff] }
 0x70d   :  { %v1171_v45 = vmax.f32 %v1155_v60, 0.0 }
 0x711   :  { %1762 = vmatmul.msk.f32.gmra.mxu2 %vm181_vm0, %v1158_v62 }
 0x719   :  { %1763 = vmatmul.msk.f32.gmra.mxu2 %vm181_vm0, %v1159_v16 }
 0x721   :  { %1764 = vmatmul.msk.f32.gmra.mxu2 %vm181_vm0, %v1160_v20 }
 0x729   :  { %1765 = vmatmul.msk.f32.gmra.mxu2 %vm181_vm0, %v1161_v24 }
 0x731   :  { %1766 = vmatmul.msk.f32.gmra.mxu2 %vm181_vm0, %v1162_v28 }
 0x739   :  { %1767 = vmatmul.msk.f32.gmra.mxu2 %vm181_vm0, %v1163_v33 }
 0x741   :  { %1768 = vmatmul.msk.f32.gmra.mxu2 %vm181_vm0, %v1164_v1 }
 0x749   :  { %1769 = vmatmul.msk.f32.gmra.mxu2 %vm181_vm0, %v1165_v37 }
 0x751   :  { %1770 = vmatmul.msk.f32.gmra.mxu2 %vm181_vm0, %v1166_v10 }
 0x759   :  { %1771 = vmatmul.msk.f32.gmra.mxu2 %vm181_vm0, %v1167_v4 }
 0x761   :  { %1772 = vmatmul.msk.f32.gmra.mxu2 %vm181_vm0, %v1168_v42 }
 0x769   :  { %1773 = vmatmul.msk.f32.gmra.mxu2 %vm181_vm0, %v1169_v39 }
 0x771   :  { %1774 = vmatmul.msk.f32.gmra.mxu2 %vm181_vm0, %v1170_v58 }
 0x779   :  { %1775 = vmatmul.msk.f32.gmra.mxu2 %vm181_vm0, %v1171_v45 }
 0x784   :  { %v1237_v61 = vpop.f32.mrf.mxu2 }
 0x785   :  { %v1238_v54 = vadd.f32 %v2472_v34, %v1237_v61 }
 0x787   :  { %v1285_v56 = vmax.f32 %v1238_v54, 0.0 }
 0x78c   :  { %v1240_v62 = vpop.f32.mrf.mxu2 }
 0x78d   :  { %v1241_v42 = vadd.f32 %v2472_v34, %v1240_v62 }
 0x78f   :  { %v1286_v39 = vmax.f32 %v1241_v42, 0.0 }
 0x794   :  { %v1243_v14 = vpop.f32.mrf.mxu2 }
 0x795   :  { %v1244_v3 = vadd.f32 %v2472_v34, %v1243_v14 }
 0x797   :  { %v1287_v55 = vmax.f32 %v1244_v3, 0.0 }
 0x79c   :  { %v1246_v63 = vpop.f32.mrf.mxu2 }
 0x79d   :  { %v1247_v4 = vadd.f32 %v2472_v34, %v1246_v63 }
 0x79f   :  { %v1288_v53 = vmax.f32 %v1247_v4, 0.0 }
 0x7a4   :  { %v1249_v15 = vpop.f32.mrf.mxu2 }
 0x7a5   :  { %v1250_v12 = vadd.f32 %v2472_v34, %v1249_v15 }
 0x7a7   :  { %v1289_v52 = vmax.f32 %v1250_v12, 0.0 }
 0x7ac   :  { %v1252_v16 = vpop.f32.mrf.mxu2 }
 0x7ad   :  { %v1253_v10 = vadd.f32 %v2472_v34, %v1252_v16 }
 0x7af   :  { %v1290_v50 = vmax.f32 %v1253_v10, 0.0 }
 0x7b4   :  { %v1255_v17 = vpop.f32.mrf.mxu2 }
 0x7b5   :  { %v1256_v41 = vadd.f32 %v2472_v34, %v1255_v17 }
 0x7b7   :  { %v1291_v13 = vmax.f32 %v1256_v41, 0.0 }
 0x7bc   :  { %v1258_v18 = vpop.f32.mrf.mxu2 }
 0x7bd   :  { %v1259_v37 = vadd.f32 %v2472_v34, %v1258_v18 }
 0x7bf   :  { %v1292_v11 = vmax.f32 %v1259_v37, 0.0 }
 0x7c4   :  { %v1261_v19 = vpop.f32.mrf.mxu2 }
 0x7cc   :  { %v1264_v20 = vpop.f32.mrf.mxu2 }
 0x7cd   :  { %v1265_v8 = vadd.f32 %v2472_v34, %v1264_v20 }
 0x7cf   :  { %v1294_v40 = vmax.f32 %v1265_v8, 0.0 }
 0x7d4   :  { %v1267_v21 = vpop.f32.mrf.mxu2 }
 0x7d5   :  { %v1268_v0 = vadd.f32 %v2472_v34, %v1267_v21 }
 0x7d7   :  { %v1295_v6 = vmax.f32 %v1268_v0, 0.0 }
 0x7dc   :  { %v1270_v22 = vpop.f32.mrf.mxu2 }
 0x7dd   :  { %v1271_v2 = vadd.f32 %v2472_v34, %v1270_v22 }
 0x7df   :  { %v1296_v9 = vmax.f32 %v1271_v2, 0.0 }
 0x7e4   :  { %v1273_v23 = vpop.f32.mrf.mxu2 }
 0x7e5   :  { %v1274_v32 = vadd.f32 %v2232_v49, %v1273_v23 }
 0x7e7   :  { %v1297_v1 = vmax.f32 %v1274_v32, 0.0 }
 0x7ec   :  { %v1276_v24 = vpop.f32.mrf.mxu2 }
 0x7ed   :  { %v1277_v29 = vadd.f32 %v2232_v49, %v1276_v24 }
 0x7ef   :  { %v1298_v5 = vmax.f32 %v1277_v29, 0.0 }
 0x7f4   :  { %v1279_v25 = vpop.f32.mrf.mxu2 }
 0x7f5   :  { %v1280_v27 = vadd.f32 %v2232_v49, %v1279_v25 }
 0x7f7   :  { %v1299_v33 = vmax.f32 %v1280_v27, 0.0 }
 0x7fc   :  { %v1282_v26 = vpop.f32.mrf.mxu2 }
 0x7fd   :  { %v1283_v28 = vadd.f32 %v2232_v49, %v1282_v26  ;;  %v1262_v49 = vadd.f32 %v2472_v34, %v1261_v19 }
 0x7ff   :  { %v1300_v30 = vmax.f32 %v1283_v28, 0.0  ;;  %v1293_v43 = vmax.f32 %v1262_v49, 0.0 }
 0x801   :  { %1301 = vmatpush.msra.mxu3 %v1300_v30 }
 0x803   :  { %1302 = vmatpush.msra.mxu3 %v1299_v33 }
 0x805   :  { %1303 = vmatpush.msra.mxu3 %v1298_v5 }
 0x807   :  { %1304 = vmatpush.msra.mxu3 %v1297_v1 }
 0x809   :  { %1305 = vmatpush.msra.mxu3 %v1296_v9 }
 0x80b   :  { %1306 = vmatpush.msra.mxu3 %v1295_v6 }
 0x80d   :  { %1307 = vmatpush.msra.mxu3 %v1294_v40 }
 0x80f   :  { %1308 = vmatpush.msra.mxu3 %v1293_v43 }
 0x811   :  { %1309 = vmatpush.msra.mxu3 %v1292_v11 }
 0x813   :  { %1310 = vmatpush.msra.mxu3 %v1291_v13 }
 0x815   :  { %1311 = vmatpush.msra.mxu3 %v1290_v50 }
 0x817   :  { %1312 = vmatpush.msra.mxu3 %v1289_v52 }
 0x819   :  { %1313 = vmatpush.msra.mxu3 %v1288_v53 }
 0x81b   :  { %1314 = vmatpush.msra.mxu3 %v1287_v55 }
 0x81d   :  { %1315 = vmatpush.msra.mxu3 %v1286_v39 }
 0x81f   :  { %1316 = vmatpush.msra.mxu3 %v1285_v56 }
 0x820   :  { %1317 = vmatmul.f32.vlgmr.msra.gmra.mxu3 %v2250_v38 }
 0x821   :  { %1367 = vmatpush.msrb.mxu3 %v2416_v36 }
 0x823   :  { %1368 = vmatpush.msrb.mxu3 %v2419_v44 }
 0x825   :  { %1369 = vmatpush.msrb.mxu3 %v2422_v46 }
 0x827   :  { %1370 = vmatpush.msrb.mxu3 %v2425_v47 }
 0x828   :  { %1320 = vmatmul.f32.gmra.mxu3 %v2255_v35 }
 0x8a3   :  { %v1318_v7 = vpop.f32.mrf.mxu3 }
 0x8a4   :  { %v2493_v57 = vadd.f32 %v1318_v7, %v2429_v48 }
 0x8a6   :  { %1776 = vmatmul.msk.f32.vlgmr.msrb.gmra.mxu0 %vm181_vm0, %v2493_v57  ;;  %1778 = vmatmul.msk.f32.vlgmr.msrb.gmra.mxu3 %vm181_vm0, %v2493_v57 }
 0x8ab   :  { %v1321_v38 = vpop.f32.mrf.mxu3 }
 0x8ac   :  { %v2500_v36 = vadd.f32 %v1321_v38, %v2434_v51 }
 0x8ae   :  { %1777 = vmatmul.msk.f32.gmra.mxu0 %vm181_vm0, %v2500_v36  ;;  %1779 = vmatmul.msk.f32.gmra.mxu3 %vm181_vm0, %v2500_v36 }
 0x923   :  { %v1349_v35 = vpop.f32.mrf.mxu0 }
 0x924   :  { %v1350_v44 = vadd.f32 %v2453_v31, %v1349_v35 }
 0x926   :  { %v1394_v46 = vperm.slane %v1350_v44, 0  ;;  %v1380_v47 = vrot.slane %v1350_v44, 1  ;;  %v1381_v51 = vrot.slane %v1350_v44, 2  ;;  %v1382_v63 = vrot.slane %v1350_v44, 3 }
 0x927   :  { %v1383_v18 = vrot.slane %v1350_v44, 4  ;;  %v1384_v22 = vrot.slane %v1350_v44, 5  ;;  %v1385_v26 = vrot.slane %v1350_v44, 6  ;;  %v1386_v30 = vrot.slane %v1350_v44, 7 }
 0x928   :  { %v1395_v60 = vperm.slane %v1380_v47, 0  ;;  %v1396_v62 = vperm.slane %v1381_v51, 0  ;;  %v1397_v16 = vperm.slane %v1382_v63, 0 }
 0x929   :  { %v1372_v48 = vpop.f32.mrf.mxu3  ;;  %v1398_v20 = vperm.slane %v1383_v18, 0  ;;  %v1399_v24 = vperm.slane %v1384_v22, 0  ;;  %v1400_v28 = vperm.slane %v1385_v26, 0  ;;  %v1401_v33 = vperm.slane %v1386_v30, 0 }
 0x92a   :  { %v1426_v58 = vadd.f32 %v1394_v46, %v1372_v48  ;;  %v1427_v45 = vadd.f32 %v1395_v60, %v1372_v48  ;;  %v1428_v14 = vadd.f32 %v1396_v62, %v1372_v48  ;;  %v1429_v17 = vadd.f32 %v1397_v16, %v1372_v48 }
 0x92b   :  { %v1430_v21 = vadd.f32 %v1398_v20, %v1372_v48  ;;  %v1431_v25 = vadd.f32 %v1399_v24, %v1372_v48  ;;  %v1432_v29 = vadd.f32 %v1400_v28, %v1372_v48  ;;  %v1352_v2 = vpop.f32.mrf.mxu0  ;;  %v1433_v5 = vadd.f32 %v1401_v33, %v1372_v48 }
 0x92c   :  { %v1442_v59 = vmax.f32 %v1426_v58, 0.0  ;;  %v1443_v61 = vmax.f32 %v1427_v45, 0.0  ;;  %v1444_v15 = vmax.f32 %v1428_v14, 0.0  ;;  %v1445_v19 = vmax.f32 %v1429_v17, 0.0 }
 0x92d   :  { %v1446_v23 = vmax.f32 %v1430_v21, 0.0  ;;  %v1447_v27 = vmax.f32 %v1431_v25, 0.0  ;;  %v1448_v32 = vmax.f32 %v1432_v29, 0.0  ;;  %v1353_v0 = vadd.f32 %v2453_v31, %v1352_v2 }
 0x92e   :  { %1780 = vmatmul.msk.f32.vlgmr.msra.gmra.mxu0 %vm181_vm0, %v1442_v59  ;;  %v1449_v1 = vmax.f32 %v1433_v5, 0.0 }
 0x92f   :  { %v1402_v9 = vperm.slane %v1353_v0, 0  ;;  %v1387_v6 = vrot.slane %v1353_v0, 1  ;;  %v1388_v43 = vrot.slane %v1353_v0, 2  ;;  %v1389_v13 = vrot.slane %v1353_v0, 3 }
 0x930   :  { %v1390_v3 = vrot.slane %v1353_v0, 4  ;;  %v1391_v54 = vrot.slane %v1353_v0, 5  ;;  %v1392_v7 = vrot.slane %v1353_v0, 6  ;;  %v1393_v46 = vrot.slane %v1353_v0, 7 }
 0x931   :  { %v1375_v8 = vpop.f32.mrf.mxu3  ;;  %v1403_v40 = vperm.slane %v1387_v6, 0  ;;  %v1404_v11 = vperm.slane %v1388_v43, 0  ;;  %v1405_v4 = vperm.slane %v1389_v13, 0 }
 0x932   :  { %v1434_v49 = vadd.f32 %v1402_v9, %v1375_v8  ;;  %v1406_v42 = vperm.slane %v1390_v3, 0  ;;  %v1407_v39 = vperm.slane %v1391_v54, 0  ;;  %v1408_v35 = vperm.slane %v1392_v7, 0  ;;  %v162_v7 = vld [vmem:[#allocation11 + $0x8] sm:$0xff] }
 0x933   :  { %v1435_v41 = vadd.f32 %v1403_v40, %v1375_v8  ;;  %v1436_v12 = vadd.f32 %v1404_v11, %v1375_v8  ;;  %v1437_v50 = vadd.f32 %v1405_v4, %v1375_v8  ;;  %v1409_v48 = vperm.slane %v1393_v46, 0 }
 0x934   :  { %v1450_v37 = vmax.f32 %v1434_v49, 0.0  ;;  %v1438_v53 = vadd.f32 %v1406_v42, %v1375_v8  ;;  %v1439_v56 = vadd.f32 %v1407_v39, %v1375_v8  ;;  %v1440_v44 = vadd.f32 %v1408_v35, %v1375_v8  ;;  %v1827_v39 = vld [vmem:[#allocation5] sm:$0xff]  ;;  %v168_v35 = vld [vmem:[#allocation13 + $0x18] sm:$0xff] }
 0x935   :  { %v1451_v10 = vmax.f32 %v1435_v41, 0.0  ;;  %v1452_v31 = vmax.f32 %v1436_v12, 0.0  ;;  %v1453_v52 = vmax.f32 %v1437_v50, 0.0  ;;  %v1441_v58 = vadd.f32 %v1409_v48, %v1375_v8  ;;  %v163_v8 = vld [vmem:[#allocation11 + $0x10] sm:$0xff] }
 0x936   :  { %1781 = vmatmul.msk.f32.gmra.mxu0 %vm181_vm0, %v1443_v61  ;;  %v1454_v55 = vmax.f32 %v1438_v53, 0.0  ;;  %v1455_v38 = vmax.f32 %v1439_v56, 0.0  ;;  %v1456_v47 = vmax.f32 %v1440_v44, 0.0  ;;  %v1828_v56 = vld [vmem:[#allocation5 + $0x8] sm:$0xff]  ;;  %v167_v48 = vld [vmem:[#allocation13 + $0x10] sm:$0xff] }
 0x937   :  { %v1457_v59 = vmax.f32 %v1441_v58, 0.0  ;;  %v166_v58 = vld [vmem:[#allocation13 + $0x8] sm:$0xff] }
 0x93e   :  { %1782 = vmatmul.msk.f32.gmra.mxu0 %vm181_vm0, %v1444_v15 }
 0x946   :  { %1783 = vmatmul.msk.f32.gmra.mxu0 %vm181_vm0, %v1445_v19 }
 0x94e   :  { %1784 = vmatmul.msk.f32.gmra.mxu0 %vm181_vm0, %v1446_v23 }
 0x956   :  { %1785 = vmatmul.msk.f32.gmra.mxu0 %vm181_vm0, %v1447_v27 }
 0x95e   :  { %1786 = vmatmul.msk.f32.gmra.mxu0 %vm181_vm0, %v1448_v32 }
 0x966   :  { %1787 = vmatmul.msk.f32.gmra.mxu0 %vm181_vm0, %v1449_v1  ;;  %v164_v1 = vld [vmem:[#allocation11 + $0x18] sm:$0xff] }
 0x967   :  { %1630 = vmatpush.msra.mxu3 %v164_v1 }
 0x969   :  { %1631 = vmatpush.msra.mxu3 %v163_v8 }
 0x96b   :  { %1632 = vmatpush.msra.mxu3 %v162_v7 }
 0x96e   :  { %1788 = vmatmul.msk.f32.gmra.mxu0 %vm181_vm0, %v1450_v37 }
 0x976   :  { %1789 = vmatmul.msk.f32.gmra.mxu0 %vm181_vm0, %v1451_v10 }
 0x97e   :  { %1790 = vmatmul.msk.f32.gmra.mxu0 %vm181_vm0, %v1452_v31 }
 0x986   :  { %1791 = vmatmul.msk.f32.gmra.mxu0 %vm181_vm0, %v1453_v52 }
 0x98e   :  { %1792 = vmatmul.msk.f32.gmra.mxu0 %vm181_vm0, %v1454_v55 }
 0x996   :  { %1793 = vmatmul.msk.f32.gmra.mxu0 %vm181_vm0, %v1455_v38  ;;  %v161_v38 = vld [vmem:[#allocation11] sm:$0xff] }
 0x997   :  { %1633 = vmatpush.msra.mxu3 %v161_v38 }
 0x999   :  { %1661 = vmatpush.msrb.mxu3 %v168_v35 }
 0x99b   :  { %1662 = vmatpush.msrb.mxu3 %v167_v48 }
 0x99d   :  { %1663 = vmatpush.msrb.mxu3 %v166_v58 }
 0x99e   :  { %1794 = vmatmul.msk.f32.gmra.mxu0 %vm181_vm0, %v1456_v47 }
 0x9a6   :  { %1795 = vmatmul.msk.f32.gmra.mxu0 %vm181_vm0, %v1457_v59  ;;  %v165_v59 = vld [vmem:[#allocation13] sm:$0xff] }
 0x9a7   :  { %1664 = vmatpush.msrb.mxu3 %v165_v59 }
 0x9ab   :  { %v1523_v60 = vpop.f32.mrf.mxu0 }
 0x9ac   :  { %v1524_v42 = vadd.f32 %v2472_v34, %v1523_v60  ;;  %v1816_v60 = vld [vmem:[%s2563_s8] ss:$0 sm:$0xff] }
 0x9ae   :  { %v1571_v55 = vmax.f32 %v1524_v42, 0.0 }
 0x9b3   :  { %v1526_v45 = vpop.f32.mrf.mxu0 }
 0x9b4   :  { %v1527_v3 = vadd.f32 %v2472_v34, %v1526_v45 }
 0x9b6   :  { %v1572_v54 = vmax.f32 %v1527_v3, 0.0 }
 0x9bb   :  { %v1529_v51 = vpop.f32.mrf.mxu0 }
 0x9bc   :  { %v1530_v4 = vadd.f32 %v2472_v34, %v1529_v51 }
 0x9be   :  { %v1573_v53 = vmax.f32 %v1530_v4, 0.0 }
 0x9c3   :  { %v1532_v61 = vpop.f32.mrf.mxu0 }
 0x9c4   :  { %v1533_v13 = vadd.f32 %v2472_v34, %v1532_v61 }
 0x9c6   :  { %v1574_v52 = vmax.f32 %v1533_v13, 0.0 }
 0x9cb   :  { %v1535_v62 = vpop.f32.mrf.mxu0 }
 0x9cc   :  { %v1536_v11 = vadd.f32 %v2472_v34, %v1535_v62 }
 0x9ce   :  { %v1575_v50 = vmax.f32 %v1536_v11, 0.0 }
 0x9d3   :  { %v1538_v14 = vpop.f32.mrf.mxu0 }
 0x9d4   :  { %v1539_v43 = vadd.f32 %v2472_v34, %v1538_v14 }
 0x9d6   :  { %v1576_v31 = vmax.f32 %v1539_v43, 0.0 }
 0x9db   :  { %v1541_v63 = vpop.f32.mrf.mxu0 }
 0x9dc   :  { %v1542_v40 = vadd.f32 %v2472_v34, %v1541_v63 }
 0x9de   :  { %v1577_v12 = vmax.f32 %v1542_v40, 0.0 }
 0x9e3   :  { %v1544_v15 = vpop.f32.mrf.mxu0 }
 0x9e4   :  { %v1545_v6 = vadd.f32 %v2472_v34, %v1544_v15 }
 0x9e6   :  { %v1578_v10 = vmax.f32 %v1545_v6, 0.0 }
 0x9eb   :  { %v1547_v16 = vpop.f32.mrf.mxu0 }
 0x9ec   :  { %v1548_v9 = vadd.f32 %v2472_v34, %v1547_v16 }
 0x9ee   :  { %v1579_v41 = vmax.f32 %v1548_v9, 0.0 }
 0x9f3   :  { %v1550_v17 = vpop.f32.mrf.mxu0 }
 0x9f4   :  { %v1551_v5 = vadd.f32 %v2472_v34, %v1550_v17 }
 0x9f6   :  { %v1580_v37 = vmax.f32 %v1551_v5, 0.0 }
 0x9fb   :  { %v1553_v18 = vpop.f32.mrf.mxu0 }
 0x9fc   :  { %v1554_v33 = vadd.f32 %v2472_v34, %v1553_v18 }
 0x9fe   :  { %v1581_v49 = vmax.f32 %v1554_v33, 0.0 }
 0xa03   :  { %v1556_v19 = vpop.f32.mrf.mxu0 }
 0xa04   :  { %v1557_v30 = vadd.f32 %v2472_v34, %v1556_v19 }
 0xa06   :  { %v1582_v0 = vmax.f32 %v1557_v30, 0.0 }
 0xa0b   :  { %v1559_v20 = vpop.f32.mrf.mxu0 }
 0xa0c   :  { %v1560_v28 = vadd.f32 %v2472_v34, %v1559_v20 }
 0xa0e   :  { %v1583_v2 = vmax.f32 %v1560_v28, 0.0 }
 0xa13   :  { %v1562_v21 = vpop.f32.mrf.mxu0 }
 0xa14   :  { %v1563_v26 = vadd.f32 %v2472_v34, %v1562_v21 }
 0xa16   :  { %v1584_v32 = vmax.f32 %v1563_v26, 0.0 }
 0xa1b   :  { %v1565_v22 = vpop.f32.mrf.mxu0 }
 0xa1c   :  { %v1566_v24 = vadd.f32 %v2472_v34, %v1565_v22 }
 0xa1e   :  { %v1585_v29 = vmax.f32 %v1566_v24, 0.0 }
 0xa23   :  { %v1568_v23 = vpop.f32.mrf.mxu0 }
 0xa24   :  { %v1569_v25 = vadd.f32 %v2472_v34, %v1568_v23 }
 0xa26   :  { %v1586_v27 = vmax.f32 %v1569_v25, 0.0 }
 0xa28   :  { %1587 = vmatpush.msrb.mxu1 %v1586_v27 }
 0xa2a   :  { %1588 = vmatpush.msrb.mxu1 %v1585_v29 }
 0xa2c   :  { %1589 = vmatpush.msrb.mxu1 %v1584_v32 }
 0xa2e   :  { %1590 = vmatpush.msrb.mxu1 %v1583_v2 }
 0xa30   :  { %1591 = vmatpush.msrb.mxu1 %v1582_v0 }
 0xa32   :  { %1592 = vmatpush.msrb.mxu1 %v1581_v49 }
 0xa34   :  { %1593 = vmatpush.msrb.mxu1 %v1580_v37 }
 0xa36   :  { %1594 = vmatpush.msrb.mxu1 %v1579_v41 }
 0xa38   :  { %1595 = vmatpush.msrb.mxu1 %v1578_v10 }
 0xa3a   :  { %1596 = vmatpush.msrb.mxu1 %v1577_v12 }
 0xa3c   :  { %1597 = vmatpush.msrb.mxu1 %v1576_v31 }
 0xa3e   :  { %1598 = vmatpush.msrb.mxu1 %v1575_v50 }
 0xa40   :  { %1599 = vmatpush.msrb.mxu1 %v1574_v52 }
 0xa42   :  { %1600 = vmatpush.msrb.mxu1 %v1573_v53 }
 0xa44   :  { %1601 = vmatpush.msrb.mxu1 %v1572_v54 }
 0xa46   :  { %1602 = vmatpush.msrb.mxu1 %v1571_v55 }
 0xa47   :  { %1603 = vmatmul.f32.vlgmr.msrb.gmra.mxu1 %v1827_v39 }
 0xa4f   :  { %1606 = vmatmul.f32.gmra.mxu1 %v1828_v56 }
 0xac4   :  { %v1604_v44 = vpop.f32.mrf.mxu1 }
 0xac5   :  { %v1610_v34 = vadd.f32 %v1604_v44, %v2493_v57 }
 0xac7   :  { %1796 = vmatmul.msk.f32.vlgmr.msra.gmra.mxu3 %vm181_vm0, %v1610_v34 }
 0xacc   :  { %v1607_v46 = vpop.f32.mrf.mxu1 }
 0xacd   :  { %v1611_v47 = vadd.f32 %v1607_v46, %v2500_v36 }
 0xacf   :  { %1797 = vmatmul.msk.f32.gmra.mxu3 %vm181_vm0, %v1611_v47 }
 0xb4a   :  { %v1635_v45 = vpop.f32.mrf.mxu3 }
 0xb4b   :  { %v1636_v51 = vadd.f32 %v1816_v60, %v1635_v45 }
 0xb4d   :  { %v1641_v57 = vmax.f32 %v1636_v51, 0.0 }
 0xb4f   :  { %1798 = vmatmul.msk.f32.vlgmr.msrb.gmra.mxu3 %vm181_vm0, %v1641_v57 }
 0xb52   :  { %v1638_v61 = vpop.f32.mrf.mxu3 }
 0xb53   :  { %v1639_v62 = vadd.f32 %v1816_v60, %v1638_v61 }
 0xb55   :  { %v1642_v36 = vmax.f32 %v1639_v62, 0.0 }
 0xb57   :  { %1799 = vmatmul.msk.f32.gmra.mxu3 %vm181_vm0, %v1642_v36 }
 0xbd2   :  { %v1666_v14 = vpop.f32.mrf.mxu3 }
 0xbd3   :  { %1672 = vst [vmem:[#allocation14] sm:$0xff] %v1666_v14 }
 0xbda   :  { %v1669_v63 = vpop.f32.mrf.mxu3 }
 0xbdb   :  { %1673 = vst [vmem:[#allocation14 + $0x8] sm:$0xff] %v1669_v63 }
 0xbdc   :  { %1686 = dma.vmem_to_hbm [thread:$0]  %s1679_s7, 256, %s1681_s14, [#allocation4], %s2032_s21, %s2032_s21, %s2033_s22  }
 0xbdd   :  { %2029 = dma.done.wait [#allocation4], 256  }
 0xbde   :  { %2030 = vsyncadd [#allocation4], 4294967040 }
 0xbdf   :  { %1691 = vsyncpa [#allocation3], 1 }
 0xbe0   :  { %1692 = vsyncpa [#allocation6], 1 }
 0xbe1   :  { %1693 = vsyncpa [#allocation9], 1 }
 0xbe2   :  { %1694 = vsyncpa [#allocation12], 1 }
 0xbe3   :  { %1695 = vsyncpa [#allocation4], 1 }

</bundles_post_ra>
